<compile_context>
chip_gen: v7x
topology: tpu7x:2x2x1
jax: 0.10.0
libtpu: 0.0.40
codegen_flags: <defaults>
</compile_context>

<pallas_src>
import jax
import jax.numpy as jnp
from jax.experimental import pallas as pl
from jax.experimental.pallas import tpu as pltpu


# ----------------------------------------------------------------------------
# Standalone Bahdanau attention kernel (W(features) precomputed in wrapper).
# ----------------------------------------------------------------------------
def _make_attn_kernel(return_alpha, L, L_pad):
    def kernel(wf_ref, feat_ref, uhb_ref, v_ref, *out_refs):
        ctx_ref = out_refs[0]
        # tanh(W(features) + U(hidden)) ;  uhb already holds hidden@U + Ub + Wb
        score = jnp.tanh(wf_ref[...] + uhb_ref[...][:, None, :])     # (tb, L, A)
        # v(score).squeeze(-1): lane reduction -> lane-major (tb, L) logits.
        # (v-bias omitted: softmax over L is invariant to a constant shift.)
        logits = jnp.sum(score * v_ref[...], axis=-1)                # (tb, L)
        m = jnp.max(logits, axis=-1, keepdims=True)
        e = jnp.exp(logits - m)
        alpha = e / jnp.sum(e, axis=-1, keepdims=True)               # (tb, L)
        # context: VPU broadcast-multiply + sublane reduce (no 1xL MXU pushes).
        ctx_ref[...] = jnp.sum(alpha[:, :, None] * feat_ref[...], axis=1)
        if return_alpha:
            alpha_ref = out_refs[1]
            if L_pad > L:   # lane-dense store, sliced back in the wrapper
                alpha = jnp.concatenate(
                    [alpha, jnp.zeros((alpha.shape[0], L_pad - L), alpha.dtype)],
                    axis=-1)
            alpha_ref[...] = alpha
    return kernel


def bahdanau_attention(features, hidden, params, *, tb=None, return_alpha=False):
    """features: (B, L, F) f32, hidden: (B, H) f32.

    Semantics identical to the PyTorch BahdanauAttention.forward.
    tb=None -> grid=1 (single-TC v5e/v6e default); on v7x use tb=B//2.
    """
    B, L, F = features.shape
    A = params["W"].shape[1]

    # Hoisted out of the kernel (and, in a decoder loop, out of the time loop):
    wf = features @ params["W"] + params["Wb"]                      # (B, L, A)
    uhb = hidden @ params["U"] + params["Ub"][None, :]              # (B, A)
    v_row = params["v"].reshape(1, A)

    if tb is None:
        tb = B
    grid_b = pl.cdiv(B, tb)
    B_pad = grid_b * tb
    if B_pad != B:
        pad = B_pad - B
        wf = jnp.pad(wf, ((0, pad), (0, 0), (0, 0)))
        features = jnp.pad(features, ((0, pad), (0, 0), (0, 0)))
        uhb = jnp.pad(uhb, ((0, pad), (0, 0)))

    L_pad = ((L + 127) // 128) * 128   # lane-dense alpha output

    rep = lambda b: (0, 0)

    out_shape = [jax.ShapeDtypeStruct((B_pad, F), jnp.float32)]
    out_specs = [pl.BlockSpec((tb, F), lambda b: (b, 0))]
    if return_alpha:
        out_shape.append(jax.ShapeDtypeStruct((B_pad, L_pad), jnp.float32))
        out_specs.append(pl.BlockSpec((tb, L_pad), lambda b: (b, 0)))

    outs = pl.pallas_call(
        _make_attn_kernel(return_alpha, L, L_pad),
        out_shape=tuple(out_shape),
        grid_spec=pltpu.PrefetchScalarGridSpec(
            num_scalar_prefetch=0,
            grid=(grid_b,),
            in_specs=[
                pl.BlockSpec((tb, L, A), lambda b: (b, 0, 0)),   # wf
                pl.BlockSpec((tb, L, F), lambda b: (b, 0, 0)),   # features
                pl.BlockSpec((tb, A), lambda b: (b, 0)),         # hidden@U + biases
                pl.BlockSpec((1, A), rep),                       # v row (replicated)
            ],
            out_specs=out_specs,
        ),
        compiler_params=pltpu.CompilerParams(
            dimension_semantics=("parallel",),
        ),
    )(wf, features, uhb, v_row)

    ctx = outs[0][:B]
    if return_alpha:
        return ctx, outs[1][:B, :L]
    return ctx


bahdanau_attention_jit = jax.jit(bahdanau_attention,
                                 static_argnames=("tb", "return_alpha"))


# ----------------------------------------------------------------------------
# Fused DecoderWithAttention.forward: one pallas_call, grid over timesteps.
# features / wf / weights stay VMEM-resident across t; h, c carried in scratch.
# ----------------------------------------------------------------------------
def _decoder_fused_kernel(wf_ref, feat_ref, emb_ref, u_ref, ub_ref, v_ref,
                          wxe_ref, wxc_ref, wh_ref, bg_ref, wo_ref, bo_ref,
                          out_ref, h_ref, c_ref):
    t = pl.program_id(0)

    @pl.when(t == 0)
    def _init():
        h_ref[...] = jnp.zeros_like(h_ref)
        c_ref[...] = jnp.zeros_like(c_ref)

    h = h_ref[...]                                             # (B, H)
    c = c_ref[...]                                             # (B, H)

    # --- Bahdanau attention (W(features) hoisted to the wrapper as wf) ------
    uhb = jnp.dot(h, u_ref[...],
                  preferred_element_type=jnp.float32) + ub_ref[...]   # (B, A)
    score = jnp.tanh(wf_ref[...] + uhb[:, None, :])            # (B, L, A)
    logits = jnp.sum(score * v_ref[...], axis=-1)              # (B, L)
    m = jnp.max(logits, axis=-1, keepdims=True)
    e = jnp.exp(logits - m)
    alpha = e / jnp.sum(e, axis=-1, keepdims=True)
    # context as a VPU weighted sum (alpha itself is not an output here).
    ctx = jnp.sum(alpha[:, :, None] * feat_ref[...], axis=1)   # (B, F)

    # --- LSTMCell (W_ih pre-split so no lane concat of [emb_t, ctx]) --------
    emb_t = emb_ref[0]                                         # (B, E)
    gates = (jnp.dot(emb_t, wxe_ref[...], preferred_element_type=jnp.float32)
             + jnp.dot(ctx, wxc_ref[...], preferred_element_type=jnp.float32)
             + jnp.dot(h, wh_ref[...], preferred_element_type=jnp.float32)
             + bg_ref[...])                                    # (B, 4H)
    hd = h_ref.shape[1]
    i_g = jax.nn.sigmoid(gates[:, 0 * hd:1 * hd])
    f_g = jax.nn.sigmoid(gates[:, 1 * hd:2 * hd])
    g_g = jnp.tanh(gates[:, 2 * hd:3 * hd])
    o_g = jax.nn.sigmoid(gates[:, 3 * hd:4 * hd])
    c_new = f_g * c + i_g * g_g
    h_new = o_g * jnp.tanh(c_new)
    h_ref[...] = h_new
    c_ref[...] = c_new

    # --- fcn (nn.Dropout is identity in eval mode) ---------------------------
    out_ref[0] = (jnp.dot(h_new, wo_ref[...], preferred_element_type=jnp.float32)
                  + bo_ref[...])


def decoder_forward(features, captions, params):
    """Fused DecoderWithAttention.forward. Returns (B, T-1, vocab)."""
    B, L, F = features.shape
    ap, lp, fp = params["attn"], params["lstm"], params["fcn"]
    A = ap["W"].shape[1]
    H = lp["W_hh"].shape[1]
    E = params["E"].shape[1]
    V = fp["W"].shape[1]
    T = captions.shape[1] - 1

    # Hoisted, hidden-independent work (done once per sequence, not per step).
    wf = features @ ap["W"] + ap["Wb"]                         # (B, L, A)
    emb = params["E"][captions[:, :-1]]                        # (B, T, E)  gather in XLA
    emb_tm = jnp.transpose(emb, (1, 0, 2))                     # (T, B, E)  t-major blocks

    ub = ap["Ub"].reshape(1, A)                                # (v-bias dropped: shift inv.)
    v_row = ap["v"].reshape(1, A)

    # LSTMCell weights in right-multiply form; W_ih split at the emb/ctx seam.
    w_ih_t = lp["W_ih"].T                                      # (E+F, 4H)
    wx_e = w_ih_t[:E]                                          # (E, 4H)
    wx_c = w_ih_t[E:]                                          # (F, 4H)
    wh = lp["W_hh"].T                                          # (H, 4H)
    bg = (lp["b_ih"] + lp["b_hh"]).reshape(1, 4 * H)
    wo = fp["W"]                                               # (H, V)
    bo = fp["b"].reshape(1, V)

    const2 = lambda t: (0, 0)
    const3 = lambda t: (0, 0, 0)

    logits_tm = pl.pallas_call(
        _decoder_fused_kernel,
        out_shape=jax.ShapeDtypeStruct((T, B, V), jnp.float32),
        grid_spec=pltpu.PrefetchScalarGridSpec(
            num_scalar_prefetch=0,
            grid=(T,),
            in_specs=[
                pl.BlockSpec((B, L, A), const3),               # wf   (VMEM-resident)
                pl.BlockSpec((B, L, F), const3),               # features (VMEM-resident)
                pl.BlockSpec((1, B, E), lambda t: (t, 0, 0)),  # emb for step t
                pl.BlockSpec((H, A), const2),                  # U
                pl.BlockSpec((1, A), const2),                  # Ub + (Wb folded into wf)
                pl.BlockSpec((1, A), const2),                  # v
                pl.BlockSpec((E, 4 * H), const2),              # W_ih (emb part)
                pl.BlockSpec((F, 4 * H), const2),              # W_ih (ctx part)
                pl.BlockSpec((H, 4 * H), const2),              # W_hh
                pl.BlockSpec((1, 4 * H), const2),              # b_ih + b_hh
                pl.BlockSpec((H, V), const2),                  # fcn W
                pl.BlockSpec((1, V), const2),                  # fcn b
            ],
            out_specs=pl.BlockSpec((1, B, V), lambda t: (t, 0, 0)),
            scratch_shapes=[
                pltpu.VMEM((B, H), jnp.float32),               # h carried across t
                pltpu.VMEM((B, H), jnp.float32),               # c carried across t
            ],
        ),
        compiler_params=pltpu.CompilerParams(
            dimension_semantics=("arbitrary",),                # sequential recurrence
        ),
    )(wf, features, emb_tm, ap["U"], ub, v_row, wx_e, wx_c, wh, bg, wo, bo)

    return jnp.transpose(logits_tm, (1, 0, 2))                 # (B, T, vocab)


decoder_forward_jit = jax.jit(decoder_forward)


# ----------------------------------------------------------------------------
# Pure-JAX references mirroring the PyTorch module exactly (include v-bias).
# ----------------------------------------------------------------------------
def _attention_reference(features, hidden, p):
    wf = features @ p["W"] + p["Wb"]
    uh = hidden @ p["U"] + p["Ub"]
    score = jnp.tanh(wf + uh[:, None, :])
    attn = jnp.einsum("bla,a->bl", score, p["v"]) + p["vb"]
    alpha = jax.nn.softmax(attn, axis=1)
    context = jnp.sum(features * alpha[..., None], axis=1)
    return context, alpha


def _decoder_reference(features, captions, params):
    B = features.shape[0]
    H = params["lstm"]["W_hh"].shape[1]
    h = jnp.zeros((B, H), jnp.float32)
    c = jnp.zeros((B, H), jnp.float32)
    emb = params["E"][captions[:, :-1]]
    lp = params["lstm"]
    outs = []
    for t in range(emb.shape[1]):
        ctx, _alpha = _attention_reference(features, h, params["attn"])
        x = jnp.concatenate([emb[:, t, :], ctx], axis=-1)
        gates = x @ lp["W_ih"].T + lp["b_ih"] + h @ lp["W_hh"].T + lp["b_hh"]
        i, f, g, o = jnp.split(gates, 4, axis=-1)              # torch gate order
        c = jax.nn.sigmoid(f) * c + jax.nn.sigmoid(i) * jnp.tanh(g)
        h = jax.nn.sigmoid(o) * jnp.tanh(c)
        # TODO(synk): nn.Dropout omitted (eval-mode identity).
        logits = h @ params["fcn"]["W"] + params["fcn"]["b"]
        outs.append(logits[:, None, :])
    return jnp.concatenate(outs, axis=1)


# ----------------------------------------------------------------------------
# Parameter init (deterministic, nn.Linear-style uniform fan-in scaling).
# ----------------------------------------------------------------------------
def _linear_init(kw, kb, fan_in, fan_out):
    bound = 1.0 / jnp.sqrt(jnp.float32(fan_in))
    w = jax.random.uniform(kw, (fan_in, fan_out), jnp.float32, -bound, bound)
    b = jax.random.uniform(kb, (fan_out,), jnp.float32, -bound, bound)
    return w, b


def init_decoder_params(key, vocab_size, embed_size, hidden_size, feature_dim, attn_dim):
    ks = jax.random.split(key, 13)

    W, Wb = _linear_init(ks[0], ks[1], feature_dim, attn_dim)
    U, Ub = _linear_init(ks[2], ks[3], hidden_size, attn_dim)
    vw, vb = _linear_init(ks[4], ks[5], attn_dim, 1)
    attn = {"W": W, "Wb": Wb, "U": U, "Ub": Ub, "v": vw[:, 0], "vb": vb[0]}

    E = 0.1 * jax.random.normal(ks[6], (vocab_size, embed_size), jnp.float32)

    in_dim = embed_size + feature_dim
    bound = 1.0 / jnp.sqrt(jnp.float32(hidden_size))
    lstm = {
        "W_ih": jax.random.uniform(ks[7], (4 * hidden_size, in_dim), jnp.float32, -bound, bound),
        "W_hh": jax.random.uniform(ks[8], (4 * hidden_size, hidden_size), jnp.float32, -bound, bound),
        "b_ih": jax.random.uniform(ks[9], (4 * hidden_size,), jnp.float32, -bound, bound),
        "b_hh": jax.random.uniform(ks[10], (4 * hidden_size,), jnp.float32, -bound, bound),
    }

    Wf, bf = _linear_init(ks[11], ks[12], hidden_size, vocab_size)
    fcn = {"W": Wf, "b": bf}

    return {"attn": attn, "E": E, "lstm": lstm, "fcn": fcn}


if __name__ == "__main__":
    # Small shapes, lane-dense where it matters (F = A = 128).
    B, L, FEAT, H, A = 16, 16, 128, 32, 128
    VOCAB, EMBED, T = 50, 32, 8

    key = jax.random.PRNGKey(0)
    k_feat, k_hid, k_cap, k_par = jax.random.split(key, 4)
    features = jax.random.normal(k_feat, (B, L, FEAT), dtype=jnp.float32)
    hidden = jax.random.normal(k_hid, (B, H), dtype=jnp.float32)
    captions = jax.random.randint(k_cap, (B, T), 0, VOCAB)
    params = init_decoder_params(k_par, VOCAB, EMBED, H, FEAT, A)

    # --- standalone attention kernel (context-only and context+alpha) -------
    ctx_only = bahdanau_attention_jit(features, hidden, params["attn"])
    ctx, alpha = bahdanau_attention_jit(features, hidden, params["attn"],
                                        return_alpha=True)
    jax.block_until_ready((ctx_only, ctx, alpha))
    ctx_ref, alpha_ref = _attention_reference(features, hidden, params["attn"])
    assert ctx.shape == (B, FEAT) and alpha.shape == (B, L)
    assert jnp.allclose(jnp.sum(alpha, axis=1), 1.0, atol=1e-5)
    assert jnp.allclose(alpha, alpha_ref, atol=1e-4, rtol=1e-4)
    assert jnp.allclose(ctx, ctx_ref, atol=1e-4, rtol=1e-4)
    assert jnp.allclose(ctx_only, ctx_ref, atol=1e-4, rtol=1e-4)

    # --- fused full DecoderWithAttention.forward (single pallas_call) -------
    out = decoder_forward_jit(features, captions, params)
    jax.block_until_ready(out)
    out_ref = _decoder_reference(features, captions, params)
    assert out.shape == (B, T - 1, VOCAB)
    assert jnp.allclose(out, out_ref, atol=1e-3, rtol=1e-3)

    print("KERNEL_OK")
</pallas_src>

<mosaic_0001>
module attributes {stable_mosaic.version = 11 : i64} {
  func.func @kernel(%arg0: i32, %arg1: memref<16x16x128xf32, #tpu.memory_space<vmem>>, %arg2: memref<16x16x128xf32, #tpu.memory_space<vmem>>, %arg3: memref<16x128xf32, #tpu.memory_space<vmem>>, %arg4: memref<1x128xf32, #tpu.memory_space<vmem>>, %arg5: memref<16x128xf32, #tpu.memory_space<vmem>>) attributes {dimension_semantics = [#tpu.dimension_semantics<parallel>], iteration_bounds = array<i64: 1>, scalar_prefetch = 0 : i64, scratch_operands = 0 : i64, tpu.core_type = #tpu.core_type<tc>, window_params = [{transform_indices = @transform_0, window_bounds = array<i64: 16, 16, 128>}, {transform_indices = @transform_1, window_bounds = array<i64: 16, 16, 128>}, {transform_indices = @transform_2, window_bounds = array<i64: 16, 128>}, {pipeline_mode = #tpu.pipeline_mode<synchronous>, transform_indices = @transform_3, window_bounds = array<i64: 1, 128>}, {transform_indices = @transform_4, window_bounds = array<i64: 16, 128>}]} {
    %c0 = arith.constant 0 : index
    %c0_0 = arith.constant 0 : index
    %c0_1 = arith.constant 0 : index
    %0 = vector.load %arg1[%c0, %c0_0, %c0_1] : memref<16x16x128xf32, #tpu.memory_space<vmem>>, vector<16x16x128xf32>
    %c0_2 = arith.constant 0 : index
    %c0_3 = arith.constant 0 : index
    %1 = vector.load %arg3[%c0_2, %c0_3] : memref<16x128xf32, #tpu.memory_space<vmem>>, vector<16x128xf32>
    %2 = vector.shape_cast %1 : vector<16x128xf32> to vector<16x1x128xf32>
    %3 = vector.broadcast %2 : vector<16x1x128xf32> to vector<16x16x128xf32>
    %4 = arith.addf %0, %3 : vector<16x16x128xf32>
    %5 = math.tanh %4 : vector<16x16x128xf32>
    %c0_4 = arith.constant 0 : index
    %c0_5 = arith.constant 0 : index
    %6 = vector.load %arg4[%c0_4, %c0_5] : memref<1x128xf32, #tpu.memory_space<vmem>>, vector<1x128xf32>
    %7 = vector.shape_cast %6 : vector<1x128xf32> to vector<1x1x128xf32>
    %8 = vector.broadcast %7 : vector<1x1x128xf32> to vector<16x16x128xf32>
    %9 = arith.mulf %5, %8 : vector<16x16x128xf32>
    %cst = arith.constant dense<0.000000e+00> : vector<16x16xf32>
    %10 = vector.multi_reduction <add>, %9, %cst [2] : vector<16x16x128xf32> to vector<16x16xf32>
    %cst_6 = arith.constant dense<0xFF800000> : vector<16xf32>
    %11 = vector.multi_reduction <maximumf>, %10, %cst_6 [1] : vector<16x16xf32> to vector<16xf32>
    %12 = vector.shape_cast %11 : vector<16xf32> to vector<16x1xf32>
    %13 = vector.broadcast %12 : vector<16x1xf32> to vector<16x16xf32>
    %14 = arith.subf %10, %13 : vector<16x16xf32>
    %15 = math.exp %14 : vector<16x16xf32>
    %cst_7 = arith.constant dense<0.000000e+00> : vector<16xf32>
    %16 = vector.multi_reduction <add>, %15, %cst_7 [1] : vector<16x16xf32> to vector<16xf32>
    %17 = vector.shape_cast %16 : vector<16xf32> to vector<16x1xf32>
    %18 = vector.broadcast %17 : vector<16x1xf32> to vector<16x16xf32>
    %19 = arith.divf %15, %18 : vector<16x16xf32>
    %20 = vector.shape_cast %19 : vector<16x16xf32> to vector<16x16x1xf32>
    %c0_8 = arith.constant 0 : index
    %c0_9 = arith.constant 0 : index
    %c0_10 = arith.constant 0 : index
    %21 = vector.load %arg2[%c0_8, %c0_9, %c0_10] : memref<16x16x128xf32, #tpu.memory_space<vmem>>, vector<16x16x128xf32>
    %22 = vector.broadcast %20 : vector<16x16x1xf32> to vector<16x16x128xf32>
    %23 = arith.mulf %22, %21 : vector<16x16x128xf32>
    %cst_11 = arith.constant dense<0.000000e+00> : vector<16x128xf32>
    %24 = vector.multi_reduction <add>, %23, %cst_11 [1] : vector<16x16x128xf32> to vector<16x128xf32>
    %c0_12 = arith.constant 0 : index
    %c0_13 = arith.constant 0 : index
    %25 = vector.load %arg5[%c0_12, %c0_13] : memref<16x128xf32, #tpu.memory_space<vmem>>, vector<16x128xf32>
    tpu.vector_store %arg5[%c0_12, %c0_13], %24 {strides = array<i32>} : memref<16x128xf32, #tpu.memory_space<vmem>>, vector<16x128xf32>,
    return
  }
  func.func @transform_0(%arg0: i32) -> (i32, i32, i32) {
    %c0_i32 = arith.constant 0 : i32
    %c0_i32_0 = arith.constant 0 : i32
    %c0_i32_1 = arith.constant 0 : i32
    return %arg0, %c0_i32, %c0_i32_0 : i32, i32, i32
  }
  func.func @transform_1(%arg0: i32) -> (i32, i32, i32) {
    %c0_i32 = arith.constant 0 : i32
    %c0_i32_0 = arith.constant 0 : i32
    %c0_i32_1 = arith.constant 0 : i32
    return %arg0, %c0_i32, %c0_i32_0 : i32, i32, i32
  }
  func.func @transform_2(%arg0: i32) -> (i32, i32) {
    %c0_i32 = arith.constant 0 : i32
    %c0_i32_0 = arith.constant 0 : i32
    return %arg0, %c0_i32 : i32, i32
  }
  func.func @transform_3(%arg0: i32) -> (i32, i32) {
    %c0_i32 = arith.constant 0 : i32
    %c0_i32_0 = arith.constant 0 : i32
    %c0_i32_1 = arith.constant 0 : i32
    return %c0_i32, %c0_i32_0 : i32, i32
  }
  func.func @transform_4(%arg0: i32) -> (i32, i32) {
    %c0_i32 = arith.constant 0 : i32
    %c0_i32_0 = arith.constant 0 : i32
    return %arg0, %c0_i32 : i32, i32
  }
}

</mosaic_0001>

<bundles_post_ra>
// kernel: bahdanau_attention.1
= control target key start
LH: loop header
LB: loop body
LE: loop exit
PB: predicated region body
PF: predicated region fallthrough
CT: control target
= control target key end

     0   :  { %v58_v0 = vlaneseq  ;;  %v1791_v1 = vmov 1966171168   ;;  %s2661_s0 = inlined_call_operand.vmem [shape: f32[16,16,128], index: 0, kind: input, shape index: {}]   ;;  %s2662_s1 = inlined_call_operand.vmem [shape: f32[16,16,128], index: 1, kind: input, shape index: {}]   ;;  %s2663_s2 = inlined_call_operand.vmem [shape: f32[16,128], index: 2, kind: input, shape index: {}]   ;;  %s2664_s3 = inlined_call_operand.vmem [shape: f32[1,128], index: 3, kind: input, shape index: {}]   ;;  %s2665_s4 = inlined_call_operand.hbm [shape: f32[16,128], index: 4, kind: output, shape index: {}]  }
   0x1   :  { %v56_v2 = vunpack.c.l.s4 %v1791_v1  ;;  %v50_v4 = vld [vmem:[%s2663_s2] sm:$0xff]  ;;  %v1830_v7 = vld [vmem:[%s2663_s2 + $0x8] sm:$0xff] }
   0x2   :  { %v1822_v3 = vshrl.u32 %v58_v0, 7  ;;  %v54_v6 = vcombine.high %v50_v4, %v50_v4  ;;  %v35_v17 = vld [vmem:[%s2661_s0 + $0x88] sm:$0xff]  ;;  %v18_v18 = vld [vmem:[%s2661_s0] sm:$0xff] }
   0x3   :  { %v57_v5 = vunpack.c.0.s8 %v56_v2  ;;  %v27_v19 = vld [vmem:[%s2661_s0 + $0x48] sm:$0xff] }
   0x4   :  { %v1838_v10 = vsub.s32 0, %v1822_v3  ;;  %v19_v24 = vld [vmem:[%s2661_s0 + $0x8] sm:$0xff] }
   0x5   :  { %v1833_v8 = vsub.s32 %v57_v5, %v1822_v3 }
   0x7   :  { %v110_v9 = vrot.slane %v1830_v7, %v1833_v8  ;;  %v61_v11 = vrot.slane %v50_v4, %v1833_v8  ;;  %v1842_v12 = vrot.slane %v54_v6, %v1833_v8 }
   0x9   :  { %v126_v13 = vrot.slane %v110_v9, %v1833_v8  ;;  %v77_v14 = vrot.slane %v61_v11, %v1833_v8  ;;  %v1848_v15 = vrot.slane %v1842_v12, %v1833_v8  ;;  %v69_v16 = vcombine.high %v61_v11, %v61_v11 }
   0xa   :  { %v118_v20 = vcombine.high %v110_v9, %v110_v9 }
   0xb   :  { %v187_v21 = vrot.slane %v126_v13, %v1838_v10  ;;  %v155_v22 = vrot.slane %v77_v14, %v1838_v10  ;;  %v171_v23 = vrot.slane %v1848_v15, %v1838_v10  ;;  %v91_v25 = vrot.slane %v69_v16, %v1833_v8 }
   0xc   :  { %9 = vsyncpa [#allocation3], 0  ;;  %v20_v29 = vld [vmem:[%s2661_s0 + $0x10] sm:$0xff]  ;;  %v34_v30 = vld [vmem:[%s2661_s0 + $0x80] sm:$0xff]  ;;  %v1875_v33 = vrot.slane %v118_v20, %v1833_v8  ;;  %v99_v40 = vcombine.high %v77_v14, %v77_v14  ;;  %v148_v44 = vcombine.high %v126_v13, %v126_v13  ;;  %v103_v53 = vcombine.high %v1830_v7, %v1830_v7 }
   0xd   :  { %v249_v26 = vadd.f32 %v187_v21, %v35_v17  ;;  %v232_v27 = vadd.f32 %v155_v22, %v18_v18  ;;  %v241_v28 = vadd.f32 %v171_v23, %v27_v19  ;;  %v233_v31 = vadd.f32 %v155_v22, %v19_v24  ;;  %v21_v36 = vld [vmem:[%s2661_s0 + $0x18] sm:$0xff]  ;;  %v26_v37 = vld [vmem:[%s2661_s0 + $0x40] sm:$0xff]  ;;  %v36_v43 = vld [vmem:[%s2661_s0 + $0x90] sm:$0xff] }
   0xe   :  { %v159_v32 = vrot.slane %v91_v25, %v1838_v10  ;;  %v248_v35 = vadd.f32 %v187_v21, %v34_v30  ;;  %v191_v39 = vrot.slane %v1875_v33, %v1838_v10  ;;  %v240_v41 = vadd.f32 %v171_v23, %v26_v37  ;;  %v37_v42 = vld [vmem:[%s2661_s0 + $0x98] sm:$0xff]  ;;  %v1894_v45 = vld [vmem:[%s2664_s3] ss:$0 sm:$0xff]  ;;  %v23_v49 = vld [vmem:[%s2661_s0 + $0x28] sm:$0xff] }
   0xf   :  { %1607 = vtanh.f32 %v249_v26  ;;  %v163_v47 = vrot.slane %v99_v40, %v1838_v10  ;;  %v22_v51 = vld [vmem:[%s2661_s0 + $0x20] sm:$0xff]  ;;  %v195_v55 = vrot.slane %v148_v44, %v1838_v10  ;;  %v101_v59 = vcombine.high %v91_v25, %v91_v25  ;;  %v39_v63 = vld [vmem:[%s2661_s0 + $0xa8] sm:$0xff]  ;;  %v25_v16 = vld [vmem:[%s2661_s0 + $0x38] sm:$0xff] }
  0x10   :  { %1609 = vtanh.f32 %v232_v27  ;;  %v234_v34 = vadd.f32 %v159_v32, %v20_v29  ;;  %v235_v38 = vadd.f32 %v159_v32, %v21_v36  ;;  %v251_v46 = vadd.f32 %v191_v39, %v37_v42  ;;  %v38_v4 = vld [vmem:[%s2661_s0 + $0xa0] sm:$0xff]  ;;  %v24_v19 = vld [vmem:[%s2661_s0 + $0x30] sm:$0xff]  ;;  %v41_v27 = vld [vmem:[%s2661_s0 + $0xb8] sm:$0xff] }
  0x11   :  { %1611 = vtanh.f32 %v241_v28  ;;  %v250_v48 = vadd.f32 %v191_v39, %v36_v43  ;;  %v237_v58 = vadd.f32 %v163_v47, %v23_v49  ;;  %v236_v62 = vadd.f32 %v163_v47, %v22_v51  ;;  %v40_v30 = vld [vmem:[%s2661_s0 + $0xb0] sm:$0xff]  ;;  %v43_v37 = vld [vmem:[%s2661_s0 + $0xc8] sm:$0xff]  ;;  %v42_v40 = vld [vmem:[%s2661_s0 + $0xc0] sm:$0xff] }
  0x12   :  { %1613 = vtanh.f32 %v233_v31  ;;  %v117_v6 = vrot.slane %v103_v53, %v1833_v8  ;;  %v253_v7 = vadd.f32 %v195_v55, %v39_v63  ;;  %v167_v9 = vrot.slane %v101_v59, %v1838_v10  ;;  %v28_v51 = vld [vmem:[%s2661_s0 + $0x50] sm:$0xff] }
  0x13   :  { %1615 = vtanh.f32 %v234_v34  ;;  %v150_v11 = vcombine.high %v1875_v33, %v1875_v33  ;;  %v252_v14 = vadd.f32 %v195_v55, %v38_v4  ;;  %v70_v24 = vcombine.high %v1842_v12, %v1842_v12  ;;  %v31_v4 = vld [vmem:[%s2661_s0 + $0x68] sm:$0xff] }
  0x14   :  { %1617 = vtanh.f32 %v248_v35  ;;  %v1929_v21 = vrot.slane %v117_v6, %v1833_v8  ;;  %v239_v22 = vadd.f32 %v167_v9, %v25_v16  ;;  %v238_v26 = vadd.f32 %v167_v9, %v24_v19 }
  0x15   :  { %1619 = vtanh.f32 %v235_v38  ;;  %v199_v23 = vrot.slane %v150_v11, %v1838_v10  ;;  %v119_v32 = vcombine.high %v117_v6, %v117_v6  ;;  %v1945_v34 = vrot.slane %v70_v24, %v1833_v8 }
  0x16   :  { %1621 = vtanh.f32 %v240_v41  ;;  %v203_v33 = vrot.slane %v1929_v21, %v1838_v10  ;;  %v149_v63 = vcombine.high %v1929_v21, %v1929_v21  ;;  %v46_v21 = vld [vmem:[%s2661_s0 + $0xe0] sm:$0xff]  ;;  %vm442_vm0 = vcmask 130112  }
  0x17   :  { %1623 = vtanh.f32 %v251_v46  ;;  %v255_v12 = vadd.f32 %v199_v23, %v41_v27  ;;  %v254_v36 = vadd.f32 %v199_v23, %v40_v30  ;;  %v175_v43 = vrot.slane %v1945_v34, %v1838_v10 }
  0x18   :  { %1625 = vtanh.f32 %v250_v48  ;;  %v257_v42 = vadd.f32 %v203_v33, %v43_v37  ;;  %v1958_v44 = vrot.slane %v119_v32, %v1833_v8  ;;  %v256_v47 = vadd.f32 %v203_v33, %v42_v40  ;;  %v29_v48 = vld [vmem:[%s2661_s0 + $0x58] sm:$0xff] }
  0x19   :  { %v1608_v50 = vpop.eup %1607  ;;  %1627 = vtanh.f32 %v237_v58  ;;  %v243_v8 = vadd.f32 %v175_v43, %v29_v48  ;;  %vm579_vm1 = vcmask 1041409   ;;  %vm581_vm2 = vcmask 1042434  }
  0x1a   :  { %v1610_v52 = vpop.eup %1609  ;;  %v320_v54 = vmul.f32 %v1608_v50, %v1894_v45  ;;  %1629 = vtanh.f32 %v236_v62  ;;  %v207_v53 = vrot.slane %v1958_v44, %v1838_v10  ;;  %vm583_vm3 = vcmask 1043459  }
  0x1b   :  { %v1612_v56 = vpop.eup %1611  ;;  %v303_v57 = vmul.f32 %v1610_v52, %v1894_v45  ;;  %1631 = vtanh.f32 %v253_v7  ;;  %v30_v7 = vld [vmem:[%s2661_s0 + $0x60] sm:$0xff]  ;;  %vm585_vm4 = vcmask 1044484   ;;  %vm587_vm5 = vcmask 1045509  }
  0x1c   :  { %v1614_v60 = vpop.eup %1613  ;;  %369 = vadd.xlane.f32.xlu1 %v320_v54  ;;  %v312_v61 = vmul.f32 %v1612_v56, %v1894_v45  ;;  %1633 = vtanh.f32 %v252_v14  ;;  %v100_v54 = vcombine.high %v1848_v15, %v1848_v15  ;;  %v242_v56 = vadd.f32 %v175_v43, %v28_v51 }
  0x1d   :  { %v1616_v1 = vpop.eup %1615  ;;  %335 = vadd.xlane.f32.xlu0 %v303_v57  ;;  %v304_v2 = vmul.f32 %v1614_v60, %v1894_v45  ;;  %1635 = vtanh.f32 %v239_v22  ;;  %v45_v57 = vld [vmem:[%s2661_s0 + $0xd8] sm:$0xff]  ;;  %v44_v60 = vld [vmem:[%s2661_s0 + $0xd0] sm:$0xff]  ;;  %v102_v14 = vcombine.high %v1945_v34, %v1945_v34  ;;  %vm589_vm6 = vcmask 1046534  }
  0x1e   :  { %v1618_v5 = vpop.eup %1617  ;;  %v305_v13 = vmul.f32 %v1616_v1, %v1894_v45  ;;  %1637 = vtanh.f32 %v238_v26  ;;  %v259_v15 = vadd.f32 %v207_v53, %v45_v57  ;;  %v179_v62 = vrot.slane %v100_v54, %v1838_v10 }
  0x1f   :  { %v1620_v17 = vpop.eup %1619  ;;  %v319_v18 = vmul.f32 %v1618_v5, %v1894_v45  ;;  %1639 = vtanh.f32 %v255_v12  ;;  %v183_v24 = vrot.slane %v102_v14, %v1838_v10  ;;  %vm591_vm7 = vcmask 1047559  }
  0x20   :  { %353 = vadd.xlane.f32.xlu1 %v312_v61  ;;  %v1622_v20 = vpop.eup %1621  ;;  %v306_v25 = vmul.f32 %v1620_v17, %v1894_v45  ;;  %1641 = vtanh.f32 %v254_v36  ;;  %v245_v11 = vadd.f32 %v179_v62, %v31_v4  ;;  %v244_v17 = vadd.f32 %v179_v62, %v30_v7  ;;  %v49_v36 = vld [vmem:[%s2661_s0 + $0xf8] sm:$0xff] }
  0x21   :  { %337 = vadd.xlane.f32.xlu0 %v304_v2  ;;  %v1624_v28 = vpop.eup %1623  ;;  %v311_v29 = vmul.f32 %v1622_v20, %v1894_v45  ;;  %1643 = vtanh.f32 %v257_v42  ;;  %v258_v2 = vadd.f32 %v207_v53, %v44_v60  ;;  %vm602_vm8 = vcmask 130048  }
  0x22   :  { %v1626_v31 = vpop.eup %1625  ;;  %v322_v35 = vmul.f32 %v1624_v28, %v1894_v45  ;;  %1645 = vtanh.f32 %v256_v47  ;;  %v33_v28 = vld [vmem:[%s2661_s0 + $0x78] sm:$0xff] }
  0x23   :  { %v1628_v38 = vpop.eup %1627  ;;  %v321_v39 = vmul.f32 %v1626_v31, %v1894_v45  ;;  %1647 = vtanh.f32 %v243_v8  ;;  %v32_v31 = vld [vmem:[%s2661_s0 + $0x70] sm:$0xff]  ;;  %v247_v12 = vadd.f32 %v183_v24, %v33_v28 }
  0x24   :  { %339 = vadd.xlane.f32.xlu1 %v305_v13  ;;  %v1630_v41 = vpop.eup %1629  ;;  %v308_v46 = vmul.f32 %v1628_v38, %v1894_v45  ;;  %1649 = vtanh.f32 %v242_v56  ;;  %v211_v13 = vrot.slane %v149_v63, %v1838_v10 }
  0x25   :  { %367 = vadd.xlane.f32.xlu0 %v319_v18  ;;  %v1632_v49 = vpop.eup %1631  ;;  %v307_v50 = vmul.f32 %v1630_v41, %v1894_v45  ;;  %1651 = vtanh.f32 %v259_v15  ;;  %v47_v18 = vld [vmem:[%s2661_s0 + $0xe8] sm:$0xff] }
  0x26   :  { %v1634_v52 = vpop.eup %1633  ;;  %v324_v55 = vmul.f32 %v1632_v49, %v1894_v45  ;;  %1653 = vtanh.f32 %v258_v2  ;;  %v261_v23 = vadd.f32 %v211_v13, %v47_v18  ;;  %v260_v27 = vadd.f32 %v211_v13, %v46_v21 }
  0x27   :  { %v1636_v58 = vpop.eup %1635  ;;  %v323_v59 = vmul.f32 %v1634_v52, %v1894_v45  ;;  %1655 = vtanh.f32 %v245_v11 }
  0x28   :  { %341 = vadd.xlane.f32.xlu1 %v306_v25  ;;  %v1638_v61 = vpop.eup %1637  ;;  %v310_v1 = vmul.f32 %v1636_v58, %v1894_v45  ;;  %v151_v25 = vcombine.high %v1958_v44, %v1958_v44  ;;  %1657 = vtanh.f32 %v244_v17 }
  0x29   :  { %351 = vadd.xlane.f32.xlu0 %v311_v29  ;;  %v1640_v5 = vpop.eup %1639  ;;  %v309_v6 = vmul.f32 %v1638_v61, %v1894_v45  ;;  %1659 = vtanh.f32 %v261_v23 }
  0x2a   :  { %v1642_v9 = vpop.eup %1641  ;;  %v326_v16 = vmul.f32 %v1640_v5, %v1894_v45  ;;  %v215_v33 = vrot.slane %v151_v25, %v1838_v10  ;;  %1661 = vtanh.f32 %v260_v27 }
  0x2b   :  { %v1644_v19 = vpop.eup %1643  ;;  %v325_v20 = vmul.f32 %v1642_v9, %v1894_v45  ;;  %1663 = vtanh.f32 %v247_v12 }
  0x2c   :  { %373 = vadd.xlane.f32.xlu1 %v322_v35  ;;  %v1646_v22 = vpop.eup %1645  ;;  %v328_v26 = vmul.f32 %v1644_v19, %v1894_v45  ;;  %v246_v35 = vadd.f32 %v183_v24, %v32_v31  ;;  %v263_v41 = vadd.f32 %v215_v33, %v49_v36  ;;  %v432_v19 = vand.u32 127, %v58_v0 }
  0x2d   :  { %371 = vadd.xlane.f32.xlu0 %v321_v39  ;;  %v1648_v29 = vpop.eup %1647  ;;  %v327_v30 = vmul.f32 %v1646_v22, %v1894_v45  ;;  %v48_v39 = vld [vmem:[%s2661_s0 + $0xf0] sm:$0xff] }
  0x2e   :  { %v1650_v32 = vpop.eup %1649  ;;  %v314_v34 = vmul.f32 %v1648_v29, %v1894_v45  ;;  %1665 = vtanh.f32 %v246_v35  ;;  %v262_v43 = vadd.f32 %v215_v33, %v48_v39  ;;  %v437_v22 = vadd.s32 4294967288, %v432_v19 }
  0x2f   :  { %v1652_v37 = vpop.eup %1651  ;;  %v313_v38 = vmul.f32 %v1650_v32, %v1894_v45  ;;  %1667 = vtanh.f32 %v263_v41  ;;  %v2078_v25 = vsub.s32 %v432_v19, %v1822_v3 }
  0x30   :  { %345 = vadd.xlane.f32.xlu1 %v308_v46  ;;  %v1654_v40 = vpop.eup %1653  ;;  %v330_v42 = vmul.f32 %v1652_v37, %v1894_v45  ;;  %1669 = vtanh.f32 %v262_v43 }
  0x31   :  { %343 = vadd.xlane.f32.xlu0 %v307_v50  ;;  %v1656_v44 = vpop.eup %1655  ;;  %v329_v46 = vmul.f32 %v1654_v40, %v1894_v45 }
  0x32   :  { %v1658_v47 = vpop.eup %1657  ;;  %v316_v48 = vmul.f32 %v1656_v44, %v1894_v45 }
  0x33   :  { %v1660_v49 = vpop.eup %1659  ;;  %v315_v50 = vmul.f32 %v1658_v47, %v1894_v45 }
  0x34   :  { %377 = vadd.xlane.f32.xlu1 %v324_v55  ;;  %v1662_v51 = vpop.eup %1661  ;;  %v332_v52 = vmul.f32 %v1660_v49, %v1894_v45 }
  0x35   :  { %375 = vadd.xlane.f32.xlu0 %v323_v59  ;;  %v1664_v8 = vpop.eup %1663  ;;  %v331_v53 = vmul.f32 %v1662_v51, %v1894_v45 }
  0x36   :  { %v318_v55 = vmul.f32 %v1664_v8, %v1894_v45 }
  0x38   :  { %349 = vadd.xlane.f32.xlu1 %v310_v1  ;;  %v1666_v54 = vpop.eup %1665 }
  0x39   :  { %347 = vadd.xlane.f32.xlu0 %v309_v6  ;;  %v1668_v56 = vpop.eup %1667  ;;  %v317_v57 = vmul.f32 %v1666_v54, %v1894_v45 }
  0x3a   :  { %v1670_v58 = vpop.eup %1669  ;;  %v334_v59 = vmul.f32 %v1668_v56, %v1894_v45 }
  0x3b   :  { %v333_v60 = vmul.f32 %v1670_v58, %v1894_v45 }
  0x3c   :  { %381 = vadd.xlane.f32.xlu1 %v326_v16 }
  0x3d   :  { %379 = vadd.xlane.f32.xlu0 %v325_v20 }
  0x40   :  { %385 = vadd.xlane.f32.xlu1 %v328_v26  ;;  %v2081_v26 = vsub.s32 %v437_v22, %v1822_v3 }
  0x41   :  { %383 = vadd.xlane.f32.xlu0 %v327_v30 }
  0x44   :  { %357 = vadd.xlane.f32.xlu1 %v314_v34 }
  0x45   :  { %355 = vadd.xlane.f32.xlu0 %v313_v38 }
  0x48   :  { %389 = vadd.xlane.f32.xlu1 %v330_v42 }
  0x49   :  { %387 = vadd.xlane.f32.xlu0 %v329_v46 }
  0x4c   :  { %361 = vadd.xlane.f32.xlu1 %v316_v48 }
  0x4d   :  { %359 = vadd.xlane.f32.xlu0 %v315_v50 }
  0x50   :  { %393 = vadd.xlane.f32.xlu1 %v332_v52 }
  0x51   :  { %391 = vadd.xlane.f32.xlu0 %v331_v53 }
  0x54   :  { %365 = vadd.xlane.f32.xlu1 %v318_v55 }
  0x55   :  { %363 = vadd.xlane.f32.xlu0 %v317_v57 }
  0x58   :  { %397 = vadd.xlane.f32.xlu1 %v334_v59 }
  0x59   :  { %395 = vadd.xlane.f32.xlu0 %v333_v60 }
  0xa9   :  { %v2032_v61 = vpop.xlane.xlu1 %369 }
  0xaa   :  { %v2034_v15 = vpop.xlane.xlu0 %335  ;;  %v514_v36 = vrot.slane %v2032_v61, %v2081_v26 }
  0xab   :  { %v436_v32 = vrot.slane %v2034_v15, %v2078_v25 }
  0xad   :  { %v2036_v62 = vpop.xlane.xlu1 %353 }
  0xae   :  { %v2038_v63 = vpop.xlane.xlu0 %337  ;;  %v478_v38 = vrot.slane %v2036_v62, %v2081_v26 }
  0xaf   :  { %v441_v0 = vrot.slane %v2038_v63, %v2081_v26 }
  0xb1   :  { %v2040_v1 = vpop.xlane.xlu1 %339  ;;  %v443_v39 = vsel %vm442_vm0, %v441_v0, %v436_v32 }
  0xb2   :  { %v2042_v2 = vpop.xlane.xlu0 %367  ;;  %v447_v12 = vrot.slane %v2040_v1, %v2078_v25 }
  0xb3   :  { %v510_v52 = vrot.slane %v2042_v2, %v2078_v25 }
  0xb5   :  { %v2044_v4 = vpop.xlane.xlu1 %341 }
  0xb6   :  { %v2046_v5 = vpop.xlane.xlu0 %351  ;;  %v451_v29 = vrot.slane %v2044_v4, %v2081_v26 }
  0xb7   :  { %v474_v41 = vrot.slane %v2046_v5, %v2078_v25 }
  0xb8   :  { %v452_v40 = vsel %vm442_vm0, %v451_v29, %v447_v12 }
  0xb9   :  { %v2048_v6 = vpop.xlane.xlu1 %373  ;;  %v580_v8 = vsel %vm579_vm1, %v452_v40, %v443_v39  ;;  %v479_v56 = vsel %vm442_vm0, %v478_v38, %v474_v41  ;;  %v515_v41 = vsel %vm442_vm0, %v514_v36, %v510_v52 }
  0xba   :  { %v2050_v45 = vpop.xlane.xlu0 %371  ;;  %v523_v42 = vrot.slane %v2048_v6, %v2081_v26 }
  0xbb   :  { %v519_v43 = vrot.slane %v2050_v45, %v2078_v25 }
  0xbd   :  { %v2052_v7 = vpop.xlane.xlu1 %345  ;;  %v524_v60 = vsel %vm442_vm0, %v523_v42, %v519_v43 }
  0xbe   :  { %v2054_v9 = vpop.xlane.xlu0 %343  ;;  %v460_v30 = vrot.slane %v2052_v7, %v2081_v26 }
  0xbf   :  { %v456_v31 = vrot.slane %v2054_v9, %v2078_v25 }
  0xc1   :  { %v2056_v11 = vpop.xlane.xlu1 %377  ;;  %v461_v44 = vsel %vm442_vm0, %v460_v30, %v456_v31 }
  0xc2   :  { %v2058_v13 = vpop.xlane.xlu0 %375  ;;  %v532_v46 = vrot.slane %v2056_v11, %v2081_v26  ;;  %v582_v57 = vsel %vm581_vm2, %v461_v44, %v580_v8 }
  0xc3   :  { %v528_v47 = vrot.slane %v2058_v13, %v2078_v25 }
  0xc5   :  { %v2060_v14 = vpop.xlane.xlu1 %349  ;;  %v533_v29 = vsel %vm442_vm0, %v532_v46, %v528_v47  ;;  %v593_v46 = vsel %vm579_vm1, %v524_v60, %v515_v41 }
  0xc6   :  { %v2062_v16 = vpop.xlane.xlu0 %347  ;;  %v469_v33 = vrot.slane %v2060_v14, %v2081_v26 }
  0xc7   :  { %v465_v34 = vrot.slane %v2062_v16, %v2078_v25 }
  0xc9   :  { %v2064_v17 = vpop.xlane.xlu1 %381  ;;  %v470_v48 = vsel %vm442_vm0, %v469_v33, %v465_v34 }
  0xca   :  { %v2066_v18 = vpop.xlane.xlu0 %379  ;;  %v541_v58 = vrot.slane %v2064_v17, %v2081_v26  ;;  %v584_v19 = vsel %vm583_vm3, %v470_v48, %v582_v57 }
  0xcb   :  { %v537_v59 = vrot.slane %v2066_v18, %v2078_v25  ;;  %v586_v44 = vsel %vm585_vm4, %v479_v56, %v584_v19 }
  0xcd   :  { %v2069_v20 = vpop.xlane.xlu1 %385  ;;  %v542_v42 = vsel %vm442_vm0, %v541_v58, %v537_v59 }
  0xce   :  { %v2071_v21 = vpop.xlane.xlu0 %383  ;;  %v550_v22 = vrot.slane %v2069_v20, %v2081_v26 }
  0xcf   :  { %v546_v0 = vrot.slane %v2071_v21, %v2078_v25 }
  0xd1   :  { %v2073_v23 = vpop.xlane.xlu1 %357  ;;  %v551_v47 = vsel %vm442_vm0, %v550_v22, %v546_v0 }
  0xd2   :  { %v2075_v24 = vpop.xlane.xlu0 %355  ;;  %v487_v49 = vrot.slane %v2073_v23, %v2081_v26 }
  0xd3   :  { %v483_v50 = vrot.slane %v2075_v24, %v2078_v25 }
  0xd5   :  { %v2083_v27 = vpop.xlane.xlu1 %389  ;;  %v488_v30 = vsel %vm442_vm0, %v487_v49, %v483_v50  ;;  %v594_v49 = vsel %vm581_vm2, %v533_v29, %v593_v46 }
  0xd6   :  { %v2085_v28 = vpop.xlane.xlu0 %387  ;;  %v559_v31 = vrot.slane %v2083_v27, %v2081_v26  ;;  %v588_v48 = vsel %vm587_vm5, %v488_v30, %v586_v44  ;;  %v2214_v44 = vsub.s32 2, %v1822_v3 }
  0xd7   :  { %v555_v32 = vrot.slane %v2085_v28, %v2078_v25 }
  0xd9   :  { %v2103_v35 = vpop.xlane.xlu1 %361  ;;  %v560_v50 = vsel %vm442_vm0, %v559_v31, %v555_v32  ;;  %v1792_v32 = vmov 0  }
  0xda   :  { %v2107_v37 = vpop.xlane.xlu0 %359  ;;  %v496_v53 = vrot.slane %v2103_v35, %v2081_v26  ;;  %1604 = vset.pattern.permute.xlu1 %v1792_v32  ;;  %1603 = vset.pattern.permute.xlu0 %v1792_v32 }
  0xdb   :  { %v492_v54 = vrot.slane %v2107_v37, %v2078_v25 }
  0xdd   :  { %v2129_v51 = vpop.xlane.xlu1 %393  ;;  %v497_v40 = vsel %vm442_vm0, %v496_v53, %v492_v54  ;;  %v595_v53 = vsel %vm583_vm3, %v542_v42, %v594_v49 }
  0xde   :  { %v2138_v55 = vpop.xlane.xlu0 %391  ;;  %v568_v33 = vrot.slane %v2129_v51, %v2081_v26  ;;  %v590_v52 = vsel %vm589_vm6, %v497_v40, %v588_v48  ;;  %v596_v19 = vsel %vm585_vm4, %v551_v47, %v595_v53  ;;  %v2207_v40 = vsub.s32 4, %v1822_v3 }
  0xdf   :  { %v564_v34 = vrot.slane %v2138_v55, %v2078_v25  ;;  %v597_v22 = vsel %vm587_vm5, %v560_v50, %v596_v19  ;;  %v2226_v53 = vsub.s32 3, %v1822_v3 }
  0xe1   :  { %v2158_v12 = vpop.xlane.xlu1 %365  ;;  %v569_v58 = vsel %vm442_vm0, %v568_v33, %v564_v34  ;;  %v2200_v33 = vsub.s32 1, %v1822_v3 }
  0xe2   :  { %v505_v38 = vrot.slane %v2158_v12, %v2081_v26  ;;  %v2166_v39 = vpop.xlane.xlu0 %363  ;;  %v598_v29 = vsel %vm589_vm6, %v569_v58, %v597_v22 }
  0xe3   :  { %v501_v43 = vrot.slane %v2166_v39, %v2078_v25 }
  0xe5   :  { %v2179_v8 = vpop.xlane.xlu1 %397  ;;  %v506_v36 = vsel %vm442_vm0, %v505_v38, %v501_v43 }
  0xe6   :  { %v577_v54 = vrot.slane %v2179_v8, %v2081_v26  ;;  %v2186_v56 = vpop.xlane.xlu0 %395  ;;  %v592_v57 = vsel %vm591_vm7, %v506_v36, %v590_v52 }
  0xe7   :  { %v573_v59 = vrot.slane %v2186_v56, %v2078_v25  ;;  %v603_v60 = vsel %vm602_vm8, %v592_v57, -inf }
  0xe8   :  { %604 = vmax.xlane.f32.xlu0 %v603_v60 }
  0xe9   :  { %v578_v0 = vsel %vm442_vm0, %v577_v54, %v573_v59 }
  0xea   :  { %v599_v30 = vsel %vm591_vm7, %v578_v0, %v598_v29 }
  0xeb   :  { %v606_v31 = vsel %vm602_vm8, %v599_v30, -inf }
  0xec   :  { %607 = vmax.xlane.f32.xlu1 %v606_v31 }
 0x175   :  { %v2202_v34 = vpop.xlane.xlu0 %604 }
 0x176   :  { %v614_v38 = vrot.slane %v2202_v34, %v1838_v10  ;;  %v618_v41 = vrot.slane %v2202_v34, %v2200_v33  ;;  %v630_v46 = vrot.slane %v2202_v34, %v2207_v40  ;;  %v622_v36 = vrot.slane %v2202_v34, %v2214_v44 }
 0x177   :  { %v626_v58 = vrot.slane %v2202_v34, %v2226_v53 }
 0x178   :  { %v691_v42 = vsub.f32 %v2034_v15, %v614_v38  ;;  %v692_v43 = vsub.f32 %v2038_v63, %v614_v38  ;;  %v693_v47 = vsub.f32 %v2040_v1, %v618_v41  ;;  %v694_v50 = vsub.f32 %v2044_v4, %v618_v41 }
 0x179   :  { %v700_v15 = vsub.f32 %v2036_v62, %v630_v46  ;;  %v2223_v52 = vpop.xlane.xlu1 %607  ;;  %v695_v1 = vsub.f32 %v2054_v9, %v622_v36  ;;  %v696_v62 = vsub.f32 %v2052_v7, %v622_v36  ;;  %v697_v0 = vsub.f32 %v2062_v16, %v626_v58 }
 0x17a   :  { %v723_v48 = vmul.f32 1.442695, %v691_v42  ;;  %v725_v49 = vmul.f32 1.442695, %v692_v43  ;;  %v727_v63 = vmul.f32 1.442695, %v693_v47  ;;  %v646_v4 = vrot.slane %v2223_v52, %v1838_v10 }
 0x17b   :  { %v729_v54 = vmul.f32 1.442695, %v694_v50  ;;  %v741_v57 = vmul.f32 1.442695, %v700_v15  ;;  %v731_v59 = vmul.f32 1.442695, %v695_v1  ;;  %v2236_v60 = vrot.slane %v2223_v52, %v2200_v33 }
 0x17c   :  { %1671 = vpow2.f32 %v723_v48  ;;  %v708_v19 = vsub.f32 %v2032_v61, %v646_v4  ;;  %v733_v29 = vmul.f32 1.442695, %v696_v62  ;;  %v654_v7 = vrot.slane %v2223_v52, %v2214_v44 }
 0x17d   :  { %1673 = vpow2.f32 %v725_v49  ;;  %v710_v30 = vsub.f32 %v2048_v6, %v2236_v60  ;;  %v698_v32 = vsub.f32 %v2060_v14, %v626_v58  ;;  %v735_v38 = vmul.f32 1.442695, %v697_v0 }
 0x17e   :  { %1675 = vpow2.f32 %v727_v63  ;;  %v757_v31 = vmul.f32 1.442695, %v708_v19  ;;  %v2256_v16 = vrot.slane %v2223_v52, %v2226_v53  ;;  %v712_v41 = vsub.f32 %v2056_v11, %v654_v7 }
 0x17f   :  { %1677 = vpow2.f32 %v729_v54  ;;  %v761_v42 = vmul.f32 1.442695, %v710_v30  ;;  %v2264_v47 = vsub.s32 5, %v1822_v3  ;;  %v699_v14 = vsub.f32 %v2046_v5, %v630_v46 }
 0x180   :  { %1679 = vpow2.f32 %v741_v57  ;;  %v737_v48 = vmul.f32 1.442695, %v698_v32  ;;  %v2271_v11 = vrot.slane %v2223_v52, %v2207_v40  ;;  %v714_v49 = vsub.f32 %v2064_v17, %v2256_v16 }
 0x181   :  { %1681 = vpow2.f32 %v731_v59  ;;  %v765_v50 = vmul.f32 1.442695, %v712_v41  ;;  %v2279_v5 = vrot.slane %v2202_v34, %v2264_v47  ;;  %v739_v46 = vmul.f32 1.442695, %v699_v14 }
 0x182   :  { %1683 = vpow2.f32 %v733_v29  ;;  %v707_v15 = vsub.f32 %v2042_v2, %v646_v4  ;;  %v716_v63 = vsub.f32 %v2069_v20, %v2271_v11  ;;  %v769_v54 = vmul.f32 1.442695, %v714_v49 }
 0x183   :  { %1685 = vpow2.f32 %v757_v31  ;;  %v2290_v57 = vsub.s32 6, %v1822_v3  ;;  %v702_v58 = vsub.f32 %v2073_v23, %v2279_v5  ;;  %v666_v2 = vrot.slane %v2223_v52, %v2264_v47 }
 0x184   :  { %1687 = vpow2.f32 %v735_v38  ;;  %v755_v62 = vmul.f32 1.442695, %v707_v15  ;;  %v709_v20 = vsub.f32 %v2050_v45, %v2236_v60  ;;  %v773_v4 = vmul.f32 1.442695, %v716_v63 }
 0x185   :  { %1689 = vpow2.f32 %v761_v42  ;;  %v2306_v23 = vrot.slane %v2202_v34, %v2290_v57  ;;  %v745_v0 = vmul.f32 1.442695, %v702_v58  ;;  %v711_v29 = vsub.f32 %v2058_v13, %v654_v7 }
 0x186   :  { %v2239_v9 = vpop.eup %1671  ;;  %1691 = vpow2.f32 %v737_v48  ;;  %v718_v45 = vsub.f32 %v2083_v27, %v666_v2  ;;  %v759_v60 = vmul.f32 1.442695, %v709_v20  ;;  %v2317_v32 = vsub.s32 7, %v1822_v3 }
 0x187   :  { %v2241_v22 = vpop.eup %1673  ;;  %820 = vperm.xlu0 %1603, %v2239_v9   ;;  %1693 = vpow2.f32 %v765_v50  ;;  %v704_v38 = vsub.f32 %v2103_v35, %v2306_v23  ;;  %v763_v13 = vmul.f32 1.442695, %v711_v29  ;;  %v670_v27 = vrot.slane %v2223_v52, %v2290_v57 }
 0x188   :  { %823 = vperm.xlu1 %1604, %v2241_v22   ;;  %v2250_v61 = vpop.eup %1675  ;;  %1695 = vpow2.f32 %v739_v46  ;;  %2682 = vst [vmem:[#allocation5_spill] sm:$0xff] %v2317_v32  ;;  %v713_v7 = vsub.f32 %v2066_v18, %v2256_v16  ;;  %v777_v41 = vmul.f32 1.442695, %v718_v45  ;;  %v715_v35 = vsub.f32 %v2071_v21, %v2271_v11 }
 0x189   :  { %v2259_v43 = vpop.eup %1677  ;;  %1697 = vpow2.f32 %v769_v54  ;;  %v749_v14 = vmul.f32 1.442695, %v704_v38  ;;  %v642_v48 = vrot.slane %v2202_v34, %v2317_v32  ;;  %v720_v18 = vsub.f32 %v2129_v51, %v670_v27 }
 0x18a   :  { %v2261_v6 = vpop.eup %1679  ;;  %1699 = vpow2.f32 %v755_v62  ;;  %v767_v16 = vmul.f32 1.442695, %v713_v7  ;;  %v701_v46 = vsub.f32 %v2075_v24, %v2279_v5  ;;  %v771_v21 = vmul.f32 1.442695, %v715_v35 }
 0x18b   :  { %847 = vperm.xlu0 %1603, %v2261_v6   ;;  %v2275_v36 = vpop.eup %1681  ;;  %1701 = vpow2.f32 %v773_v4  ;;  %v706_v11 = vsub.f32 %v2158_v12, %v642_v48  ;;  %v674_v51 = vrot.slane %v2223_v52, %v2317_v32  ;;  %v781_v34 = vmul.f32 1.442695, %v720_v18 }
 0x18c   :  { %826 = vperm.xlu1 %1604, %v2250_v61   ;;  %v2285_v17 = vpop.eup %1683  ;;  %1703 = vpow2.f32 %v745_v0  ;;  %v743_v54 = vmul.f32 1.442695, %v701_v46  ;;  %v717_v24 = vsub.f32 %v2085_v28, %v666_v2  ;;  %v703_v28 = vsub.f32 %v2107_v37, %v2306_v23 }
 0x18d   :  { %v2287_v1 = vpop.eup %1685  ;;  %1705 = vpow2.f32 %v759_v60  ;;  %v753_v5 = vmul.f32 1.442695, %v706_v11  ;;  %v722_v12 = vsub.f32 %v2179_v8, %v674_v51  ;;  %v719_v0 = vsub.f32 %v2138_v55, %v670_v27 }
 0x18e   :  { %v2300_v59 = vpop.eup %1687  ;;  %1707 = vpow2.f32 %v763_v13  ;;  %v775_v62 = vmul.f32 1.442695, %v717_v24  ;;  %v747_v8 = vmul.f32 1.442695, %v703_v28  ;;  %v705_v37 = vsub.f32 %v2166_v39, %v642_v48 }
 0x18f   :  { %871 = vperm.xlu0 %1603, %v2287_v1   ;;  %v2302_v19 = vpop.eup %1689  ;;  %1709 = vpow2.f32 %v777_v41  ;;  %v785_v2 = vmul.f32 1.442695, %v722_v12  ;;  %v779_v23 = vmul.f32 1.442695, %v719_v0  ;;  %v721_v13 = vsub.f32 %v2186_v56, %v674_v51 }
 0x190   :  { %829 = vperm.xlu1 %1604, %v2259_v43   ;;  %v2312_v30 = vpop.eup %1691  ;;  %1711 = vpow2.f32 %v749_v14  ;;  %v751_v55 = vmul.f32 1.442695, %v705_v37 }
 0x191   :  { %v2314_v31 = vpop.eup %1693  ;;  %1713 = vpow2.f32 %v767_v16  ;;  %v783_v39 = vmul.f32 1.442695, %v721_v13 }
 0x192   :  { %v2327_v42 = vpop.eup %1695  ;;  %1715 = vpow2.f32 %v771_v21 }
 0x193   :  { %877 = vperm.xlu0 %1603, %v2302_v19   ;;  %v2329_v3 = vpop.eup %1697  ;;  %1717 = vpow2.f32 %v781_v34 }
 0x194   :  { %832 = vperm.xlu1 %1604, %v2275_v36   ;;  %v2338_v49 = vpop.eup %1699  ;;  %1719 = vpow2.f32 %v743_v54 }
 0x195   :  { %v2340_v50 = vpop.eup %1701  ;;  %1721 = vpow2.f32 %v753_v5 }
 0x196   :  { %2683 = vst [vmem:[#allocation6_spill] sm:$0xff] %v2340_v50  ;;  %v2349_v15 = vpop.eup %1703  ;;  %1723 = vpow2.f32 %v775_v62 }
 0x197   :  { %883 = vperm.xlu0 %1603, %v2314_v31   ;;  %2684 = vst [vmem:[#allocation7_spill] sm:$0xff] %v2349_v15  ;;  %v2351_v63 = vpop.eup %1705  ;;  %1725 = vpow2.f32 %v785_v2 }
 0x198   :  { %835 = vperm.xlu1 %1604, %v2285_v17   ;;  %v2357_v58 = vpop.eup %1707  ;;  %1727 = vpow2.f32 %v747_v8 }
 0x199   :  { %v2359_v52 = vpop.eup %1709  ;;  %1729 = vpow2.f32 %v779_v23 }
 0x19a   :  { %2685 = vst [vmem:[#allocation8_spill] sm:$0xff] %v2359_v52  ;;  %v2365_v20 = vpop.eup %1711  ;;  %1731 = vpow2.f32 %v751_v55 }
 0x19b   :  { %889 = vperm.xlu0 %1603, %v2329_v3   ;;  %2686 = vst [vmem:[#allocation9_spill] sm:$0xff] %v2365_v20  ;;  %v2367_v4 = vpop.eup %1713  ;;  %1733 = vpow2.f32 %v783_v39 }
 0x19c   :  { %838 = vperm.xlu1 %1604, %v2300_v59   ;;  %v2372_v29 = vpop.eup %1715 }
 0x19d   :  { %2687 = vst [vmem:[#allocation10_spill] sm:$0xff] %v2372_v29  ;;  %v2374_v45 = vpop.eup %1717 }
 0x19e   :  { %2688 = vst [vmem:[#allocation11_spill] sm:$0xff] %v2374_v45  ;;  %v2379_v60 = vpop.eup %1719 }
 0x19f   :  { %895 = vperm.xlu0 %1603, %v2340_v50   ;;  %2689 = vst [vmem:[#allocation12_spill] sm:$0xff] %v2379_v60  ;;  %v2381_v38 = vpop.eup %1721 }
 0x1a0   :  { %841 = vperm.xlu1 %1604, %v2312_v30   ;;  %2690 = vst [vmem:[#allocation13_spill] sm:$0xff] %v2381_v38  ;;  %v2386_v27 = vpop.eup %1723 }
 0x1a1   :  { %2691 = vst [vmem:[#allocation14_spill] sm:$0xff] %v2386_v27  ;;  %v2388_v7 = vpop.eup %1725 }
 0x1a2   :  { %2692 = vst [vmem:[#allocation15_spill] sm:$0xff] %v2388_v7  ;;  %v2392_v41 = vpop.eup %1727 }
 0x1a3   :  { %853 = vperm.xlu0 %1603, %v2349_v15   ;;  %2693 = vst [vmem:[#allocation16_spill] sm:$0xff] %v2392_v41  ;;  %v2395_v14 = vpop.eup %1729 }
 0x1a4   :  { %844 = vperm.xlu1 %1604, %v2327_v42   ;;  %2694 = vst [vmem:[#allocation17_spill] sm:$0xff] %v2395_v14  ;;  %v2398_v56 = vpop.eup %1731 }
 0x1a5   :  { %2695 = vst [vmem:[#allocation18_spill] sm:$0xff] %v2398_v56  ;;  %v2401_v35 = vpop.eup %1733 }
 0x1a6   :  { %2696 = vst [vmem:[#allocation19_spill] sm:$0xff] %v2401_v35 }
 0x1a7   :  { %901 = vperm.xlu0 %1603, %v2359_v52  }
 0x1a8   :  { %868 = vperm.xlu1 %1604, %v2338_v49  }
 0x1ab   :  { %859 = vperm.xlu0 %1603, %v2365_v20  }
 0x1ac   :  { %874 = vperm.xlu1 %1604, %v2351_v63  }
 0x1af   :  { %907 = vperm.xlu0 %1603, %v2374_v45  }
 0x1b0   :  { %880 = vperm.xlu1 %1604, %v2357_v58  }
 0x1b3   :  { %865 = vperm.xlu0 %1603, %v2381_v38  }
 0x1b4   :  { %886 = vperm.xlu1 %1604, %v2367_v4  }
 0x1b7   :  { %913 = vperm.xlu0 %1603, %v2388_v7  }
 0x1b8   :  { %892 = vperm.xlu1 %1604, %v2372_v29  }
 0x1bc   :  { %850 = vperm.xlu1 %1604, %v2379_v60  }
 0x1c0   :  { %898 = vperm.xlu1 %1604, %v2386_v27  }
 0x1c4   :  { %856 = vperm.xlu1 %1604, %v2392_v41  }
 0x1c8   :  { %904 = vperm.xlu1 %1604, %v2395_v14  }
 0x1cc   :  { %862 = vperm.xlu1 %1604, %v2398_v56  }
 0x1d0   :  { %910 = vperm.xlu1 %1604, %v2401_v35  }
 0x206   :  { %v821_v18 = vpop.permute.xlu0 %820 }
 0x207   :  { %v824_v48 = vpop.permute.xlu1 %823  ;;  %v918_v41 = vrot.slane %v821_v18, %v2078_v25 }
 0x208   :  { %v922_v45 = vrot.slane %v824_v48, %v2081_v26 }
 0x20a   :  { %v848_v21 = vpop.permute.xlu0 %847  ;;  %v923_v48 = vsel %vm442_vm0, %v922_v45, %v918_v41 }
 0x20b   :  { %v827_v16 = vpop.permute.xlu1 %826  ;;  %v958_v18 = vrot.slane %v848_v21, %v2081_v26 }
 0x20c   :  { %v927_v20 = vrot.slane %v827_v16, %v2078_v25 }
 0x20e   :  { %v872_v51 = vpop.permute.xlu0 %871 }
 0x20f   :  { %v830_v46 = vpop.permute.xlu1 %829 }
 0x210   :  { %v931_v56 = vrot.slane %v830_v46, %v2081_v26 }
 0x212   :  { %v878_v54 = vpop.permute.xlu0 %877  ;;  %v932_v15 = vsel %vm442_vm0, %v931_v56, %v927_v20 }
 0x213   :  { %v833_v11 = vpop.permute.xlu1 %832  ;;  %v1059_v16 = vsel %vm579_vm1, %v932_v15, %v923_v48 }
 0x214   :  { %v936_v27 = vrot.slane %v833_v11, %v2078_v25  ;;  %v994_v11 = vrot.slane %v872_v51, %v2081_v26 }
 0x216   :  { %v884_v5 = vpop.permute.xlu0 %883 }
 0x217   :  { %v836_v34 = vpop.permute.xlu1 %835 }
 0x218   :  { %v940_v38 = vrot.slane %v836_v34, %v2081_v26 }
 0x21a   :  { %v890_v62 = vpop.permute.xlu0 %889  ;;  %v941_v46 = vsel %vm442_vm0, %v940_v38, %v936_v27  ;;  %v1003_v27 = vrot.slane %v878_v54, %v2081_v26 }
 0x21b   :  { %v839_v24 = vpop.permute.xlu1 %838  ;;  %v1060_v50 = vsel %vm581_vm2, %v941_v46, %v1059_v16 }
 0x21c   :  { %v945_v34 = vrot.slane %v839_v24, %v2078_v25 }
 0x21e   :  { %v2404_v8 = vpop.permute.xlu0 %895 }
 0x21f   :  { %v842_v12 = vpop.permute.xlu1 %841 }
 0x220   :  { %v949_v52 = vrot.slane %v842_v12, %v2081_v26 }
 0x222   :  { %v854_v37 = vpop.permute.xlu0 %853  ;;  %v950_v12 = vsel %vm442_vm0, %v949_v52, %v945_v34  ;;  %v1012_v52 = vrot.slane %v884_v5, %v2081_v26 }
 0x223   :  { %v845_v28 = vpop.permute.xlu1 %844  ;;  %v1061_v24 = vsel %vm583_vm3, %v950_v12, %v1060_v50 }
 0x224   :  { %v954_v32 = vrot.slane %v845_v28, %v2078_v25 }
 0x226   :  { %v902_v13 = vpop.permute.xlu0 %901  ;;  %v959_v20 = vsel %vm442_vm0, %v958_v18, %v954_v32  ;;  %v967_v32 = vrot.slane %v854_v37, %v2081_v26 }
 0x227   :  { %v869_v2 = vpop.permute.xlu1 %868  ;;  %v1062_v54 = vsel %vm585_vm4, %v959_v20, %v1061_v24 }
 0x228   :  { %v990_v45 = vrot.slane %v869_v2, %v2078_v25 }
 0x22a   :  { %v860_v35 = vpop.permute.xlu0 %859  ;;  %v995_v37 = vsel %vm442_vm0, %v994_v11, %v990_v45 }
 0x22b   :  { %v875_v0 = vpop.permute.xlu1 %874  ;;  %v976_v2 = vrot.slane %v860_v35, %v2081_v26 }
 0x22c   :  { %v999_v56 = vrot.slane %v875_v0, %v2078_v25 }
 0x22e   :  { %v908_v60 = vpop.permute.xlu0 %907 }
 0x22f   :  { %v881_v23 = vpop.permute.xlu1 %880 }
 0x230   :  { %v1008_v41 = vrot.slane %v881_v23, %v2078_v25  ;;  %v1004_v23 = vsel %vm442_vm0, %v1003_v27, %v999_v56 }
 0x231   :  { %v1066_v18 = vsel %vm579_vm1, %v1004_v23, %v995_v37 }
 0x232   :  { %v866_v21 = vpop.permute.xlu0 %865 }
 0x233   :  { %v887_v55 = vpop.permute.xlu1 %886 }
 0x234   :  { %v1017_v28 = vrot.slane %v887_v55, %v2078_v25  ;;  %v1013_v55 = vsel %vm442_vm0, %v1012_v52, %v1008_v41 }
 0x235   :  { %v1067_v20 = vsel %vm581_vm2, %v1013_v55, %v1066_v18 }
 0x236   :  { %v914_v11 = vpop.permute.xlu0 %913 }
 0x237   :  { %v893_v39 = vpop.permute.xlu1 %892 }
 0x238   :  { %v1026_v0 = vrot.slane %v893_v39, %v2078_v25  ;;  %v1039_v39 = vrot.slane %v902_v13, %v2081_v26 }
 0x23b   :  { %v851_v7 = vpop.permute.xlu1 %850 }
 0x23c   :  { %v963_v38 = vrot.slane %v851_v7, %v2078_v25  ;;  %v1021_v7 = vrot.slane %v890_v62, %v2081_v26 }
 0x23e   :  { %v968_v5 = vsel %vm442_vm0, %v967_v32, %v963_v38  ;;  %v1022_v34 = vsel %vm442_vm0, %v1021_v7, %v1017_v28 }
 0x23f   :  { %v899_v14 = vpop.permute.xlu1 %898  ;;  %v1063_v12 = vsel %vm587_vm5, %v968_v5, %v1062_v54  ;;  %v1068_v27 = vsel %vm583_vm3, %v1022_v34, %v1067_v20 }
 0x240   :  { %v1035_v50 = vrot.slane %v899_v14, %v2078_v25  ;;  %v1048_v14 = vrot.slane %v908_v60, %v2081_v26 }
 0x242   :  { %v1040_v56 = vsel %vm442_vm0, %v1039_v39, %v1035_v50 }
 0x243   :  { %v857_v29 = vpop.permute.xlu1 %856 }
 0x244   :  { %v972_v15 = vrot.slane %v857_v29, %v2078_v25  ;;  %v1030_v29 = vrot.slane %v2404_v8, %v2081_v26  ;;  %v985_v8 = vrot.slane %v866_v21, %v2081_v26 }
 0x246   :  { %v977_v62 = vsel %vm442_vm0, %v976_v2, %v972_v15  ;;  %v1031_v16 = vsel %vm442_vm0, %v1030_v29, %v1026_v0  ;;  %v1057_v15 = vrot.slane %v914_v11, %v2081_v26 }
 0x247   :  { %v905_v51 = vpop.permute.xlu1 %904  ;;  %v1064_v38 = vsel %vm589_vm6, %v977_v62, %v1063_v12  ;;  %v1069_v21 = vsel %vm585_vm4, %v1031_v16, %v1068_v27 }
 0x248   :  { %v1044_v46 = vrot.slane %v905_v51, %v2078_v25  ;;  %v1070_v24 = vsel %vm587_vm5, %v1040_v56, %v1069_v21 }
 0x24a   :  { %v1049_v45 = vsel %vm442_vm0, %v1048_v14, %v1044_v46 }
 0x24b   :  { %v863_v35 = vpop.permute.xlu1 %862  ;;  %v1071_v28 = vsel %vm589_vm6, %v1049_v45, %v1070_v24  ;;  %v2699_v45 = vld [vmem:[#allocation5_spill] sm:$0xff]  ;;  %v2703_v24 = vld [vmem:[#allocation14_spill] sm:$0xff] }
 0x24c   :  { %v981_v48 = vrot.slane %v863_v35, %v2078_v25 }
 0x24e   :  { %v986_v13 = vsel %vm442_vm0, %v985_v8, %v981_v48 }
 0x24f   :  { %v911_v41 = vpop.permute.xlu1 %910  ;;  %v1065_v60 = vsel %vm591_vm7, %v986_v13, %v1064_v38  ;;  %v2698_v13 = vld [vmem:[#allocation10_spill] sm:$0xff] }
 0x250   :  { %v1053_v51 = vrot.slane %v911_v41, %v2078_v25  ;;  %v1075_v52 = vsel %vm602_vm8, %v1065_v60, 0.0  ;;  %v2700_v41 = vld [vmem:[#allocation7_spill] sm:$0xff]  ;;  %v2701_v60 = vld [vmem:[#allocation12_spill] sm:$0xff] }
 0x251   :  { %1076 = vadd.xlane.f32.xlu1 %v1075_v52 }
 0x252   :  { %v1058_v32 = vsel %vm442_vm0, %v1057_v15, %v1053_v51  ;;  %v2702_v51 = vld [vmem:[#allocation8_spill] sm:$0xff] }
 0x253   :  { %v1072_v7 = vsel %vm591_vm7, %v1058_v32, %v1071_v28 }
 0x254   :  { %v1078_v54 = vsel %vm602_vm8, %v1072_v7, 0.0  ;;  %v2704_v7 = vld [vmem:[#allocation9_spill] sm:$0xff] }
 0x255   :  { %1079 = vadd.xlane.f32.xlu0 %v1078_v54 }
 0x2de   :  { %v2471_v2 = vpop.xlane.xlu1 %1076 }
 0x2df   :  { %v1086_v26 = vrot.slane %v2471_v2, %v1838_v10  ;;  %v1090_v25 = vrot.slane %v2471_v2, %v2200_v33  ;;  %v1094_v0 = vrot.slane %v2471_v2, %v2214_v44  ;;  %v1098_v29 = vrot.slane %v2471_v2, %v2226_v53 }
 0x2e0   :  { %v1102_v5 = vrot.slane %v2471_v2, %v2207_v40 }
 0x2e1   :  { %1735 = vrcp.f32 %v1086_v26 }
 0x2e2   :  { %1737 = vrcp.f32 %v1090_v25  ;;  %v2483_v50 = vpop.xlane.xlu0 %1079 }
 0x2e3   :  { %1739 = vrcp.f32 %v1094_v0  ;;  %v1118_v46 = vrot.slane %v2483_v50, %v1838_v10  ;;  %v1126_v10 = vrot.slane %v2483_v50, %v2214_v44  ;;  %v1134_v44 = vrot.slane %v2483_v50, %v2207_v40  ;;  %v2706_v0 = vld [vmem:[#allocation11_spill] sm:$0xff] }
 0x2e4   :  { %1741 = vrcp.f32 %v1098_v29  ;;  %v1138_v40 = vrot.slane %v2483_v50, %v2264_v47 }
 0x2e5   :  { %1743 = vrcp.f32 %v1102_v5 }
 0x2e6   :  { %1745 = vrcp.f32 %v1118_v46 }
 0x2eb   :  { %v1736_v23 = vpop.eup %1735 }
 0x2ec   :  { %v1165_v37 = vmul.f32 %v1736_v23, %v2241_v22  ;;  %v1164_v55 = vmul.f32 %v1736_v23, %v2239_v9  ;;  %v1738_v62 = vpop.eup %1737  ;;  %v1122_v22 = vrot.slane %v2483_v50, %v2200_v33  ;;  %v1130_v33 = vrot.slane %v2483_v50, %v2226_v53  ;;  %v2707_v23 = vld [vmem:[#allocation17_spill] sm:$0xff] }
 0x2ed   :  { %v1167_v35 = vmul.f32 %v1738_v62, %v2250_v61  ;;  %v1168_v39 = vmul.f32 %v1738_v62, %v2259_v43  ;;  %v1740_v34 = vpop.eup %1739  ;;  %v1106_v53 = vrot.slane %v2471_v2, %v2264_v47  ;;  %v1142_v47 = vrot.slane %v2483_v50, %v2290_v57  ;;  %v2709_v62 = vld [vmem:[#allocation18_spill] sm:$0xff] }
 0x2ee   :  { %1250 = vperm.xlu1 %1604, %v1165_v37   ;;  %1245 = vperm.xlu0 %1603, %v1164_v55   ;;  %v1170_v9 = vmul.f32 %v1740_v34, %v2275_v36  ;;  %v1171_v8 = vmul.f32 %v1740_v34, %v2285_v17  ;;  %v1742_v48 = vpop.eup %1741  ;;  %1747 = vrcp.f32 %v1122_v22  ;;  %v2708_v37 = vld [vmem:[#allocation13_spill] sm:$0xff]  ;;  %v2711_v22 = vld [vmem:[#allocation19_spill] sm:$0xff] }
 0x2ef   :  { %v1173_v61 = vmul.f32 %v1742_v48, %v2300_v59  ;;  %v1174_v43 = vmul.f32 %v1742_v48, %v2312_v30  ;;  %v1744_v18 = vpop.eup %1743  ;;  %1749 = vrcp.f32 %v1126_v10 }
 0x2f0   :  { %v1176_v36 = vmul.f32 %v1744_v18, %v2327_v42  ;;  %v1177_v17 = vmul.f32 %v1744_v18, %v2261_v6  ;;  %v1746_v14 = vpop.eup %1745  ;;  %1751 = vrcp.f32 %v1130_v33 }
 0x2f1   :  { %v1189_v59 = vmul.f32 %v1746_v14, %v2287_v1  ;;  %v1188_v30 = vmul.f32 %v1746_v14, %v2338_v49  ;;  %1753 = vrcp.f32 %v1134_v44  ;;  %v1213_v44 = vld [vmem:[%s2662_s1 + $0x10] sm:$0xff] }
 0x2f2   :  { %1255 = vperm.xlu1 %1604, %v1167_v35   ;;  %1260 = vperm.xlu0 %1603, %v1168_v39   ;;  %1755 = vrcp.f32 %v1106_v53  ;;  %v2710_v39 = vld [vmem:[#allocation15_spill] sm:$0xff] }
 0x2f3   :  { %1757 = vrcp.f32 %v1138_v40 }
 0x2f6   :  { %1265 = vperm.xlu1 %1604, %v1170_v9   ;;  %1270 = vperm.xlu0 %1603, %v1171_v8  }
 0x2f8   :  { %v1748_v16 = vpop.eup %1747 }
 0x2f9   :  { %v1192_v6 = vmul.f32 %v1748_v16, %v2302_v19  ;;  %v1191_v42 = vmul.f32 %v1748_v16, %v2351_v63  ;;  %v1750_v11 = vpop.eup %1749  ;;  %v1110_v19 = vrot.slane %v2471_v2, %v2290_v57  ;;  %v1146_v57 = vrot.slane %v2483_v50, %v2699_v45  ;;  %v1211_v16 = vld [vmem:[%s2662_s1] sm:$0xff] }
 0x2fa   :  { %1275 = vperm.xlu1 %1604, %v1173_v61   ;;  %1280 = vperm.xlu0 %1603, %v1174_v43   ;;  %v1195_v1 = vmul.f32 %v1750_v11, %v2314_v31  ;;  %v1194_v49 = vmul.f32 %v1750_v11, %v2357_v58  ;;  %v1752_v12 = vpop.eup %1751  ;;  %v2697_v31 = vld [vmem:[#allocation6_spill] sm:$0xff] }
 0x2fb   :  { %v1198_v63 = vmul.f32 %v1752_v12, %v2329_v3  ;;  %v1197_v20 = vmul.f32 %v1752_v12, %v2367_v4  ;;  %v1754_v56 = vpop.eup %1753  ;;  %1759 = vrcp.f32 %v1110_v19  ;;  %v1114_v3 = vrot.slane %v2471_v2, %v2699_v45  ;;  %v2705_v2 = vld [vmem:[#allocation16_spill] sm:$0xff] }
 0x2fc   :  { %v1201_v58 = vmul.f32 %v1754_v56, %v2697_v31  ;;  %v1200_v38 = vmul.f32 %v1754_v56, %v2698_v13  ;;  %v1756_v27 = vpop.eup %1755  ;;  %1761 = vrcp.f32 %v1142_v47  ;;  %v1215_v56 = vld [vmem:[%s2662_s1 + $0x20] sm:$0xff]  ;;  %v1216_v47 = vld [vmem:[%s2662_s1 + $0x28] sm:$0xff] }
 0x2fd   :  { %v1180_v4 = vmul.f32 %v1756_v27, %v2700_v41  ;;  %v1179_v21 = vmul.f32 %v1756_v27, %v2701_v60  ;;  %v1758_v15 = vpop.eup %1757  ;;  %1763 = vrcp.f32 %v1114_v3  ;;  %v1217_v3 = vld [vmem:[%s2662_s1 + $0x30] sm:$0xff]  ;;  %v1218_v41 = vld [vmem:[%s2662_s1 + $0x38] sm:$0xff] }
 0x2fe   :  { %1285 = vperm.xlu1 %1604, %v1176_v36   ;;  %1290 = vperm.xlu0 %1603, %v1177_v17   ;;  %v1204_v52 = vmul.f32 %v1758_v15, %v2702_v51  ;;  %v1203_v32 = vmul.f32 %v1758_v15, %v2703_v24  ;;  %1765 = vrcp.f32 %v1146_v57  ;;  %v1220_v15 = vld [vmem:[%s2662_s1 + $0x48] sm:$0xff] }
 0x302   :  { %1330 = vperm.xlu0 %1603, %v1189_v59   ;;  %1325 = vperm.xlu1 %1604, %v1188_v30   ;;  %v1214_v59 = vld [vmem:[%s2662_s1 + $0x18] sm:$0xff]  ;;  %v1212_v30 = vld [vmem:[%s2662_s1 + $0x8] sm:$0xff] }
 0x305   :  { %v1760_v28 = vpop.eup %1759 }
 0x306   :  { %1340 = vperm.xlu0 %1603, %v1192_v6   ;;  %1335 = vperm.xlu1 %1604, %v1191_v42   ;;  %v1183_v54 = vmul.f32 %v1760_v28, %v2704_v7  ;;  %v1182_v26 = vmul.f32 %v1760_v28, %v2705_v2  ;;  %v1762_v25 = vpop.eup %1761 }
 0x307   :  { %v1207_v29 = vmul.f32 %v1762_v25, %v2706_v0  ;;  %v1206_v5 = vmul.f32 %v1762_v25, %v2707_v23  ;;  %v1764_v50 = vpop.eup %1763  ;;  %v1228_v25 = vld [vmem:[%s2662_s1 + $0x88] sm:$0xff]  ;;  %v1229_v0 = vld [vmem:[%s2662_s1 + $0x90] sm:$0xff]  ;;  %v1231_v23 = vld [vmem:[%s2662_s1 + $0xa0] sm:$0xff] }
 0x308   :  { %v1186_v55 = vmul.f32 %v1764_v50, %v2708_v37  ;;  %v1185_v46 = vmul.f32 %v1764_v50, %v2709_v62  ;;  %v1766_v35 = vpop.eup %1765  ;;  %v1221_v50 = vld [vmem:[%s2662_s1 + $0x50] sm:$0xff] }
 0x309   :  { %v1210_v34 = vmul.f32 %v1766_v35, %v2710_v39  ;;  %v1209_v9 = vmul.f32 %v1766_v35, %v2711_v22  ;;  %v1234_v35 = vld [vmem:[%s2662_s1 + $0xb8] sm:$0xff] }
 0x30a   :  { %1350 = vperm.xlu0 %1603, %v1195_v1   ;;  %1345 = vperm.xlu1 %1604, %v1194_v49   ;;  %v1222_v39 = vld [vmem:[%s2662_s1 + $0x58] sm:$0xff] }
 0x30e   :  { %1360 = vperm.xlu0 %1603, %v1198_v63   ;;  %1355 = vperm.xlu1 %1604, %v1197_v20  }
 0x312   :  { %1370 = vperm.xlu0 %1603, %v1201_v58   ;;  %1365 = vperm.xlu1 %1604, %v1200_v38  }
 0x316   :  { %1300 = vperm.xlu0 %1603, %v1180_v4   ;;  %1295 = vperm.xlu1 %1604, %v1179_v21   ;;  %v1219_v21 = vld [vmem:[%s2662_s1 + $0x40] sm:$0xff] }
 0x31a   :  { %1380 = vperm.xlu0 %1603, %v1204_v52   ;;  %1375 = vperm.xlu1 %1604, %v1203_v32  }
 0x31e   :  { %1310 = vperm.xlu0 %1603, %v1183_v54   ;;  %1305 = vperm.xlu1 %1604, %v1182_v26   ;;  %v1227_v54 = vld [vmem:[%s2662_s1 + $0x80] sm:$0xff] }
 0x322   :  { %1390 = vperm.xlu0 %1603, %v1207_v29   ;;  %1385 = vperm.xlu1 %1604, %v1206_v5   ;;  %v1230_v29 = vld [vmem:[%s2662_s1 + $0x98] sm:$0xff]  ;;  %v1232_v5 = vld [vmem:[%s2662_s1 + $0xa8] sm:$0xff] }
 0x326   :  { %1320 = vperm.xlu0 %1603, %v1186_v55   ;;  %1315 = vperm.xlu1 %1604, %v1185_v46   ;;  %v1233_v46 = vld [vmem:[%s2662_s1 + $0xb0] sm:$0xff] }
 0x32a   :  { %1400 = vperm.xlu0 %1603, %v1210_v34   ;;  %1395 = vperm.xlu1 %1604, %v1209_v9  }
 0x36d   :  { %v1251_v8 = vpop.permute.xlu1 %1250  ;;  %v1246_v48 = vpop.permute.xlu0 %1245 }
 0x36e   :  { %v1404_v40 = vmul.f32 %v1251_v8, %v1212_v30  ;;  %v1403_v1 = vmul.f32 %v1246_v48, %v1211_v16  ;;  %v1235_v48 = vld [vmem:[%s2662_s1 + $0xc0] sm:$0xff]  ;;  %v1237_v16 = vld [vmem:[%s2662_s1 + $0xd0] sm:$0xff] }
 0x370   :  { %v1435_v63 = vadd.f32 %v1404_v40, %v1403_v1 }
 0x371   :  { %v1256_v10 = vpop.permute.xlu1 %1255  ;;  %v1261_v61 = vpop.permute.xlu0 %1260 }
 0x372   :  { %v1405_v53 = vmul.f32 %v1256_v10, %v1213_v44  ;;  %v1406_v6 = vmul.f32 %v1261_v61, %v1214_v59  ;;  %v1436_v13 = vrot.slane %v1435_v63, 4  ;;  %v1236_v10 = vld [vmem:[%s2662_s1 + $0xc8] sm:$0xff] }
 0x374   :  { %v1442_v49 = vadd.f32 %v1406_v6, %v1405_v53  ;;  %v1437_v57 = vadd.f32 %v1436_v13, %v1435_v63  ;;  %v1238_v53 = vld [vmem:[%s2662_s1 + $0xd8] sm:$0xff] }
 0x375   :  { %v1266_v43 = vpop.permute.xlu1 %1265  ;;  %v1271_v18 = vpop.permute.xlu0 %1270 }
 0x376   :  { %v1443_v20 = vrot.slane %v1442_v49, 4  ;;  %v1407_v38 = vmul.f32 %v1266_v43, %v1215_v56  ;;  %v1408_v27 = vmul.f32 %v1271_v18, %v1216_v47  ;;  %v1438_v37 = vrot.slane %v1437_v57, 2 }
 0x378   :  { %v1444_v45 = vadd.f32 %v1443_v20, %v1442_v49  ;;  %v1449_v51 = vadd.f32 %v1408_v27, %v1407_v38  ;;  %v1439_v49 = vadd.f32 %v1438_v37, %v1437_v57  ;;  %v1223_v27 = vld [vmem:[%s2662_s1 + $0x60] sm:$0xff] }
 0x379   :  { %v1276_v33 = vpop.permute.xlu1 %1275  ;;  %v1281_v36 = vpop.permute.xlu0 %1280 }
 0x37a   :  { %v1409_v52 = vmul.f32 %v1276_v33, %v1217_v3  ;;  %v1410_v24 = vmul.f32 %v1281_v36, %v1218_v41  ;;  %v1445_v32 = vrot.slane %v1444_v45, 2  ;;  %v1450_v55 = vrot.slane %v1449_v51, 4 }
 0x37c   :  { %v1456_v62 = vadd.f32 %v1410_v24, %v1409_v52  ;;  %v1446_v34 = vadd.f32 %v1445_v32, %v1444_v45  ;;  %v1451_v20 = vadd.f32 %v1450_v55, %v1449_v51  ;;  %v1224_v45 = vld [vmem:[%s2662_s1 + $0x68] sm:$0xff] }
 0x37d   :  { %v1286_v17 = vpop.permute.xlu1 %1285  ;;  %v1291_v14 = vpop.permute.xlu0 %1290 }
 0x37e   :  { %v1411_v28 = vmul.f32 %v1286_v17, %v1219_v21  ;;  %v1412_v7 = vmul.f32 %v1291_v14, %v1220_v15  ;;  %v1457_v6 = vrot.slane %v1456_v62, 4  ;;  %v1452_v24 = vrot.slane %v1451_v20, 2 }
 0x380   :  { %v1463_v22 = vadd.f32 %v1412_v7, %v1411_v28  ;;  %v1458_v3 = vadd.f32 %v1457_v6, %v1456_v62 }
 0x381   :  { %v1326_v42 = vpop.permute.xlu1 %1325  ;;  %v1331_v11 = vpop.permute.xlu0 %1330 }
 0x382   :  { %v1419_v18 = vmul.f32 %v1326_v42, %v1227_v54  ;;  %v1420_v14 = vmul.f32 %v1331_v11, %v1228_v25  ;;  %v1464_v42 = vrot.slane %v1463_v22, 4  ;;  %v1239_v25 = vld [vmem:[%s2662_s1 + $0xe0] sm:$0xff] }
 0x384   :  { %v1491_v13 = vadd.f32 %v1420_v14, %v1419_v18  ;;  %v1465_v21 = vadd.f32 %v1464_v42, %v1463_v22  ;;  %v1225_v18 = vld [vmem:[%s2662_s1 + $0x70] sm:$0xff] }
 0x385   :  { %v1336_v12 = vpop.permute.xlu1 %1335  ;;  %v1341_v19 = vpop.permute.xlu0 %1340 }
 0x386   :  { %v1421_v9 = vmul.f32 %v1336_v12, %v1229_v0  ;;  %v1422_v8 = vmul.f32 %v1341_v19, %v1230_v29  ;;  %v1459_v0 = vrot.slane %v1458_v3, 2  ;;  %v1466_v55 = vrot.slane %v1465_v21, 2 }
 0x388   :  { %v1498_v12 = vadd.f32 %v1422_v8, %v1421_v9 }
 0x389   :  { %v1346_v31 = vpop.permute.xlu1 %1345  ;;  %v1351_v58 = vpop.permute.xlu0 %1350 }
 0x38a   :  { %v1423_v33 = vmul.f32 %v1346_v31, %v1231_v23  ;;  %v1424_v36 = vmul.f32 %v1351_v58, %v1232_v5  ;;  %v1447_v58 = vrot.slane %v1446_v34, 1  ;;  %v1499_v15 = vrot.slane %v1498_v12, 4 }
 0x38c   :  { %v1505_v56 = vadd.f32 %v1424_v36, %v1423_v33  ;;  %v1448_v54 = vadd.f32 %v1447_v58, %v1446_v34  ;;  %v1500_v62 = vadd.f32 %v1499_v15, %v1498_v12  ;;  %v1453_v34 = vadd.f32 %v1452_v24, %v1451_v20  ;;  %v1226_v33 = vld [vmem:[%s2662_s1 + $0x78] sm:$0xff] }
 0x38d   :  { %v1356_v4 = vpop.permute.xlu1 %1355  ;;  %v1361_v60 = vpop.permute.xlu0 %1360  ;;  %v1460_v36 = vadd.f32 %v1459_v0, %v1458_v3 }
 0x38e   :  { %v1425_v44 = vmul.f32 %v1356_v4, %v1233_v46  ;;  %v1426_v59 = vmul.f32 %v1361_v60, %v1234_v35  ;;  %v1440_v60 = vrot.slane %v1439_v49, 1  ;;  %v1506_v32 = vrot.slane %v1505_v56, 4 }
 0x390   :  { %v1512_v38 = vadd.f32 %v1426_v59, %v1425_v44  ;;  %v1441_v37 = vadd.f32 %v1440_v60, %v1439_v49  ;;  %v1507_v22 = vadd.f32 %v1506_v32, %v1505_v56  ;;  %v1467_v59 = vadd.f32 %v1466_v55, %v1465_v21  ;;  %v1241_v56 = vld [vmem:[%s2662_s1 + $0xf0] sm:$0xff] }
 0x391   :  { %v1366_v2 = vpop.permute.xlu1 %1365  ;;  %v1371_v26 = vpop.permute.xlu0 %1370 }
 0x392   :  { %v1427_v40 = vmul.f32 %v1366_v2, %v1235_v48  ;;  %v1428_v1 = vmul.f32 %v1371_v26, %v1236_v10  ;;  %v1492_v2 = vrot.slane %v1491_v13, 4  ;;  %v1513_v26 = vrot.slane %v1512_v38, 4 }
 0x393   :  { %v1563_v48 = vsel %vm579_vm1, %v1448_v54, %v1441_v37  ;;  %v1468_v21 = vrot.slane %v1467_v59, 1 }
 0x394   :  { %v1519_v41 = vadd.f32 %v1428_v1, %v1427_v40  ;;  %v1493_v10 = vadd.f32 %v1492_v2, %v1491_v13  ;;  %v1508_v1 = vrot.slane %v1507_v22, 2 }
 0x395   :  { %v1296_v61 = vpop.permute.xlu1 %1295  ;;  %v1301_v43 = vpop.permute.xlu0 %1300 }
 0x396   :  { %v1413_v17 = vmul.f32 %v1296_v61, %v1221_v50  ;;  %v1414_v30 = vmul.f32 %v1301_v43, %v1222_v39  ;;  %v1520_v29 = vrot.slane %v1519_v41, 4  ;;  %v1240_v50 = vld [vmem:[%s2662_s1 + $0xe8] sm:$0xff]  ;;  %v1514_v61 = vadd.f32 %v1513_v26, %v1512_v38  ;;  %v1242_v38 = vld [vmem:[%s2662_s1 + $0xf8] sm:$0xff]  ;;  %s1793_s1 = smov [#allocation2]  }
 0x397   :  { %v1509_v15 = vadd.f32 %v1508_v1, %v1507_v22  ;;  %s1586_s7 = sshll.u32 %s1793_s1, 4  ;;  %s1587_s7 = int_to_ptr.vmem [resolvable:$true] %s1586_s7 }
 0x398   :  { %v1470_v19 = vadd.f32 %v1414_v30, %v1413_v17  ;;  %v1521_v17 = vadd.f32 %v1520_v29, %v1519_v41  ;;  %v1501_v30 = vrot.slane %v1500_v62, 2  ;;  %s1767_s8 = scalar_lea.vmem %s1587_s7, 256  ;;  %p1772_p1 = scmp.lt.s32.totalorder %s1587_s7, %s1587_s7 }
 0x399   :  { %v1376_v63 = vpop.permute.xlu1 %1375  ;;  %v1381_v11 = vpop.permute.xlu0 %1380  ;;  %p1768_p0 = scmp.ne.s32.totalorder %s1587_s7, %s1767_s8  ;;  %p1773_p2 = scmp.lt.s32.totalorder %s1767_s8, %s1767_s8 }
 0x39a   :  { %v1429_v47 = vmul.f32 %v1376_v63, %v1237_v16  ;;  %v1430_v31 = vmul.f32 %v1381_v11, %v1238_v53  ;;  %v1471_v4 = vrot.slane %v1470_v19, 4  ;;  %v1494_v63 = vrot.slane %v1493_v10, 2 }
 0x39b   :  { %v1515_v11 = vrot.slane %v1514_v61, 2  ;;  %p1774_p3 = por %p1773_p2, %p1772_p1 }
 0x39c   :  { %v1526_v57 = vadd.f32 %v1430_v31, %v1429_v47  ;;  %v1472_v23 = vadd.f32 %v1471_v4, %v1470_v19  ;;  %v1454_v19 = vrot.slane %v1453_v34, 1  ;;  %v1461_v47 = vrot.slane %v1460_v36, 1 }
 0x39d   :  { %v1306_v51 = vpop.permute.xlu1 %1305  ;;  %v1311_v52 = vpop.permute.xlu0 %1310  ;;  %v1522_v31 = vrot.slane %v1521_v17, 2  ;;  %v1516_v24 = vadd.f32 %v1515_v11, %v1514_v61  ;;  %p1775_p4 = pnand %p1774_p3, %p1768_p0 }
 0x39e   :  { %v1415_v28 = vmul.f32 %v1306_v51, %v1223_v27  ;;  %v1416_v7 = vmul.f32 %v1311_v52, %v1224_v45  ;;  %v1527_v46 = vrot.slane %v1526_v57, 4  ;;  %v1473_v14 = vrot.slane %v1472_v23, 2 }
 0x39f   :  { %v1502_v27 = vadd.f32 %v1501_v30, %v1500_v62  ;;  %v1495_v52 = vadd.f32 %v1494_v63, %v1493_v10  ;;  %v1523_v54 = vadd.f32 %v1522_v31, %v1521_v17  ;;  %v1469_v62 = vadd.f32 %v1468_v21, %v1467_v59 }
 0x3a0   :  { %v1477_v5 = vadd.f32 %v1416_v7, %v1415_v28  ;;  %v1528_v16 = vadd.f32 %v1527_v46, %v1526_v57  ;;  %v1474_v58 = vadd.f32 %v1473_v14, %v1472_v23  ;;  %v1455_v7 = vadd.f32 %v1454_v19, %v1453_v34 }
 0x3a1   :  { %v1386_v35 = vpop.permute.xlu1 %1385  ;;  %v1391_v39 = vpop.permute.xlu0 %1390  ;;  %v1496_v46 = vrot.slane %v1495_v52, 1 }
 0x3a2   :  { %v1478_v9 = vrot.slane %v1477_v5, 4  ;;  %v1431_v8 = vmul.f32 %v1386_v35, %v1239_v25  ;;  %v1432_v43 = vmul.f32 %v1391_v39, %v1240_v50  ;;  %v1529_v45 = vrot.slane %v1528_v16, 2 }
 0x3a3   :  { %v1475_v2 = vrot.slane %v1474_v58, 1  ;;  %v1503_v25 = vrot.slane %v1502_v27, 1  ;;  %v1510_v50 = vrot.slane %v1509_v15, 1  ;;  %v1517_v35 = vrot.slane %v1516_v24, 1 }
 0x3a4   :  { %v1479_v44 = vadd.f32 %v1478_v9, %v1477_v5  ;;  %v1533_v53 = vadd.f32 %v1432_v43, %v1431_v8  ;;  %v1530_v0 = vadd.f32 %v1529_v45, %v1528_v16  ;;  %v1462_v5 = vadd.f32 %v1461_v47, %v1460_v36 }
 0x3a5   :  { %v1316_v6 = vpop.permute.xlu1 %1315  ;;  %v1321_v40 = vpop.permute.xlu0 %1320  ;;  %v1564_v22 = vsel %vm581_vm2, %v1455_v7, %v1563_v48  ;;  %v1524_v9 = vrot.slane %v1523_v54, 1  ;;  %v1476_v8 = vadd.f32 %v1475_v2, %v1474_v58  ;;  %v1504_v10 = vadd.f32 %v1503_v25, %v1502_v27 }
 0x3a6   :  { %v1480_v49 = vrot.slane %v1479_v44, 2  ;;  %v1417_v42 = vmul.f32 %v1316_v6, %v1225_v18  ;;  %v1418_v12 = vmul.f32 %v1321_v40, %v1226_v33  ;;  %v1534_v20 = vrot.slane %v1533_v53, 4 }
 0x3a7   :  { %v1531_v61 = vrot.slane %v1530_v0, 1  ;;  %v1565_v33 = vsel %vm583_vm3, %v1462_v5, %v1564_v22  ;;  %v1511_v17 = vadd.f32 %v1510_v50, %v1509_v15  ;;  %v1497_v59 = vadd.f32 %v1496_v46, %v1495_v52 }
 0x3a8   :  { %v1484_v13 = vadd.f32 %v1418_v12, %v1417_v42  ;;  %v1481_v3 = vadd.f32 %v1480_v49, %v1479_v44  ;;  %v1535_v41 = vadd.f32 %v1534_v20, %v1533_v53  ;;  %v1566_v44 = vsel %vm585_vm4, %v1469_v62, %v1565_v33 }
 0x3a9   :  { %v1396_v4 = vpop.permute.xlu1 %1395  ;;  %v1401_v60 = vpop.permute.xlu0 %1400  ;;  %v1518_v30 = vadd.f32 %v1517_v35, %v1516_v24  ;;  %v1525_v53 = vadd.f32 %v1524_v9, %v1523_v54  ;;  %v1567_v48 = vsel %vm587_vm5, %v1476_v8, %v1566_v44  ;;  %v1570_v40 = vsel %vm579_vm1, %v1504_v10, %v1497_v59 }
 0x3aa   :  { %v1485_v57 = vrot.slane %v1484_v13, 4  ;;  %v1433_v51 = vmul.f32 %v1396_v4, %v1241_v56  ;;  %v1536_v32 = vrot.slane %v1535_v41, 2  ;;  %v1434_v28 = vmul.f32 %v1401_v60, %v1242_v38 }
 0x3ab   :  { %v1482_v29 = vrot.slane %v1481_v3, 1  ;;  %v1532_v1 = vadd.f32 %v1531_v61, %v1530_v0  ;;  %v1571_v12 = vsel %vm581_vm2, %v1511_v17, %v1570_v40 }
 0x3ac   :  { %v1486_v26 = vadd.f32 %v1485_v57, %v1484_v13  ;;  %v1540_v23 = vadd.f32 %v1434_v28, %v1433_v51  ;;  %v1537_v37 = vadd.f32 %v1536_v32, %v1535_v41  ;;  %v1572_v11 = vsel %vm583_vm3, %v1518_v30, %v1571_v12 }
 0x3ad   :  { %v1483_v43 = vadd.f32 %v1482_v29, %v1481_v3  ;;  %v1573_v56 = vsel %vm585_vm4, %v1525_v53, %v1572_v11 }
 0x3ae   :  { %v1487_v55 = vrot.slane %v1486_v26, 2  ;;  %v1541_v39 = vrot.slane %v1540_v23, 4  ;;  %v1538_v36 = vrot.slane %v1537_v37, 1  ;;  %v1574_v47 = vsel %vm587_vm5, %v1532_v1, %v1573_v56 }
 0x3af   :  { %v1568_v42 = vsel %vm589_vm6, %v1483_v43, %v1567_v48 }
 0x3b0   :  { %v1488_v34 = vadd.f32 %v1487_v55, %v1486_v26  ;;  %v1542_v18 = vadd.f32 %v1541_v39, %v1540_v23  ;;  %v1539_v19 = vadd.f32 %v1538_v36, %v1537_v37 }
 0x3b2   :  { %v1489_v14 = vrot.slane %v1488_v34, 1  ;;  %v1543_v16 = vrot.slane %v1542_v18, 2  ;;  %v1575_v58 = vsel %vm589_vm6, %v1539_v19, %v1574_v47 }
 0x3b4   :  { %v1490_v6 = vadd.f32 %v1489_v14, %v1488_v34  ;;  %v1544_v49 = vadd.f32 %v1543_v16, %v1542_v18 }
 0x3b6   :  { %v1569_v63 = vsel %vm591_vm7, %v1490_v6, %v1568_v42  ;;  %v1545_v20 = vrot.slane %v1544_v49, 1 }
 0x3b7   :  { %1579 = vst [vmem:[#allocation2] sm:$0xff] %v1569_v63 }
 0x3b8   :  { %v1546_v31 = vadd.f32 %v1545_v20, %v1544_v49 }
 0x3ba   :  { %v1576_v13 = vsel %vm591_vm7, %v1546_v31, %v1575_v58 }
 0x3bb   :  { %1580 = vst [vmem:[#allocation2 + $0x8] sm:$0xff] %v1576_v13 }
 0x3bc   :  { %1778 = shalt.err (!%p1775_p4)
}
 0x3bd   :  { %s1779_s11 = scalar_lea.hbm %s2665_s4, 256 }
 0x3be   :  { %p1780_p5 = scmp.ne.s32.totalorder %s2665_s4, %s1779_s11  ;;  %p1783_p6 = scmp.lt.u32.totalorder %s1779_s11, %s2665_s4 }
 0x3c0   :  { %p1785_p7 = pnand %p1783_p6, %p1780_p5 }
 0x3c2   :  { %1788 = shalt.err (!%p1785_p7)
}
 0x3c3   :  { %s1794_s16 = smov 128   ;;  %s1795_s17 = smov 8  }
 0x3c4   :  { %1592 = dma.vmem_to_hbm [thread:$0]  %s1587_s7, 256, %s2665_s4, [#allocation3], %s1794_s16, %s1794_s16, %s1795_s17  }
 0x3c5   :  { %1789 = dma.done.wait [#allocation3], 256  }
 0x3c6   :  { %1790 = vsyncadd [#allocation3], 4294967040 }
 0x3c7   :  { %1596 = vsyncpa [#allocation3], 1 }

</bundles_post_ra>
